<compile_context>
chip_gen: v7x
topology: tpu7x:2x2x1
jax: 0.10.0
libtpu: 0.0.40
codegen_flags: <defaults>
</compile_context>

<pallas_src>
import functools
import math

import jax
import jax.numpy as jnp
from jax import lax
from jax.experimental import pallas as pl
from jax.experimental.pallas import tpu as pltpu

_HALF_LOG_2PI = 0.9189385332046727  # 0.5 * log(2*pi)
_SHIFT = 6                          # recurrence shift; arguments are >= 1


def _lgamma_ge1(x):
    """lgamma(x) for x >= 1 via recurrence shift + Stirling series (f32)."""
    shift = jnp.zeros_like(x)
    z = x
    for _ in range(_SHIFT):
        shift = shift + jnp.log(z)
        z = z + 1.0
    zinv = 1.0 / z
    zinv2 = zinv * zinv
    series = zinv * (1.0 / 12.0 + zinv2 * (-1.0 / 360.0 + zinv2 *
                     (1.0 / 1260.0 - zinv2 * (1.0 / 1680.0))))
    return (z - 0.5) * jnp.log(z) - z + _HALF_LOG_2PI + series - shift


def _digamma_ge1(x):
    """digamma(x) for x >= 1 via recurrence shift + asymptotic series (f32)."""
    shift = jnp.zeros_like(x)
    z = x
    for _ in range(_SHIFT):
        shift = shift + 1.0 / z
        z = z + 1.0
    zinv = 1.0 / z
    zinv2 = zinv * zinv
    series = -0.5 * zinv - zinv2 * (1.0 / 12.0 - zinv2 *
                                    (1.0 / 120.0 - zinv2 * (1.0 / 252.0)))
    return jnp.log(z) + series - shift


def _edl_loss_kernel(logit_ref, label_ref, prior_ref, out_ref, *,
                     n_valid, num_classes, lgamma_k, block_rows):
    logit = logit_ref[...]          # (TN, K) f32
    label = label_ref[...]          # (TN, 1) i32
    prior = prior_ref[...]          # (1, K)  f32
    tn, k = logit.shape

    # one-hot via compare against the lane (class) iota -- never materialized
    # on the host, no gather.
    class_ids = lax.broadcasted_iota(jnp.int32, (tn, k), 1)
    one_hot = label == class_ids                       # (TN, K) bool
    one_hot_f = one_hot.astype(jnp.float32)

    # alpha = relu(logit) + 1  (>= 1 everywhere)
    alpha = jnp.maximum(logit, 0.0) + 1.0
    s = jnp.sum(alpha, axis=1, keepdims=True)          # (TN, 1)

    dg_alpha = _digamma_ge1(alpha)                     # (TN, K)
    dg_s = _digamma_ge1(s)                             # (TN, 1)

    # loss_ce terms: (2 - prior) * one_hot * (digamma(S) - digamma(alpha))
    ce_row = jnp.sum((2.0 - prior) * one_hot_f * (dg_s - dg_alpha),
                     axis=1, keepdims=True)            # (TN, 1)

    # kl_alpha = (alpha - 1) * (1 - one_hot) + 1  ==  where(one_hot, 1, alpha)
    kl_alpha = jnp.where(one_hot, 1.0, alpha)          # (TN, K), >= 1
    s_kl_row = jnp.sum(kl_alpha, axis=1, keepdims=True)
    first = (_lgamma_ge1(s_kl_row)
             - jnp.sum(_lgamma_ge1(kl_alpha), axis=1, keepdims=True)
             - lgamma_k)
    second = jnp.sum((kl_alpha - 1.0) *
                     (_digamma_ge1(kl_alpha) - _digamma_ge1(s_kl_row)),
                     axis=1, keepdims=True)
    kl_row = first + second                            # (TN, 1)

    # loss_cor terms: -K / S * one_hot * logit
    cor_row = jnp.sum((-float(num_classes) / s) * one_hot_f * logit,
                      axis=1, keepdims=True)           # (TN, 1)

    # Mask padded tail rows so they contribute zero to every sum.
    row_ids = (pl.program_id(0) * block_rows
               + lax.broadcasted_iota(jnp.int32, (tn, 1), 0))
    valid = row_ids < n_valid
    s_ce = jnp.sum(jnp.where(valid, ce_row, 0.0))
    s_kl = jnp.sum(jnp.where(valid, kl_row, 0.0))
    s_cor = jnp.sum(jnp.where(valid, cor_row, 0.0))

    # Lane-dense per-block partials: [sum_ce, sum_kl, sum_cor] in row 0,
    # lanes 0..2 of a (1, 8, 128) tile (unmasked full-tile store; lets the grid
    # axis stay "parallel" -> both TensorCores on v7x).
    sub = lax.broadcasted_iota(jnp.int32, (1, 8, 128), 1)
    lane = lax.broadcasted_iota(jnp.int32, (1, 8, 128), 2)
    row0 = sub == 0
    tile = jnp.where(row0 & (lane == 0), s_ce, 0.0)
    tile = jnp.where(row0 & (lane == 1), s_kl, tile)
    tile = jnp.where(row0 & (lane == 2), s_cor, tile)
    out_ref[...] = tile


def edl_loss(logit, label, epoch_num, prior,
             kl_weight=0.01, annealing_step=10, block_rows=128):
    """logit: (N, K) float32, label: (N,) int class ids, prior: (K,) float32."""
    n, k = logit.shape
    logit = logit.astype(jnp.float32)
    label2d = label.astype(jnp.int32).reshape(n, 1)
    prior2d = jnp.asarray(prior, dtype=jnp.float32).reshape(1, k)

    # Pad the batch up to a multiple of the row tile; padded rows are masked
    # inside the kernel so they contribute nothing.
    g = int(pl.cdiv(n, block_rows))
    n_pad = g * block_rows
    if n_pad != n:
        logit = jnp.pad(logit, ((0, n_pad - n), (0, 0)))
        label2d = jnp.pad(label2d, ((0, n_pad - n), (0, 0)))

    kernel = functools.partial(
        _edl_loss_kernel,
        n_valid=n,
        num_classes=k,
        lgamma_k=float(math.lgamma(k)),
        block_rows=block_rows,
    )

    partials = pl.pallas_call(
        kernel,
        out_shape=jax.ShapeDtypeStruct((g, 8, 128), jnp.float32),
        grid=(g,),
        in_specs=[
            pl.BlockSpec((block_rows, k), lambda i: (i, 0)),
            pl.BlockSpec((block_rows, 1), lambda i: (i, 0)),
            pl.BlockSpec((1, k), lambda i: (0, 0)),
        ],
        out_specs=pl.BlockSpec((1, 8, 128), lambda i: (i, 0, 0)),
        compiler_params=pltpu.CompilerParams(
            dimension_semantics=("parallel",)),
    )(logit, label2d, prior2d)

    # Tiny scalar combine in plain JAX (3 numbers).
    sums = jnp.sum(partials, axis=0)                 # (8, 128)
    s_ce, s_kl, s_cor = sums[0, 0], sums[0, 1], sums[0, 2]

    loss_ce = s_ce / n
    annealing_coef = jnp.minimum(
        jnp.float32(1.0), jnp.asarray(epoch_num / annealing_step, jnp.float32))
    loss_kl = annealing_coef * (s_kl / n)            # kl_divergence(...).mean()
    loss_cor = s_cor / n
    return loss_ce + kl_weight * (loss_kl + loss_cor)


def _edl_loss_ref(logit, label, epoch_num, prior,
                  kl_weight=0.01, annealing_step=10):
    """Pure-JAX reference mirroring the PyTorch forward exactly."""
    from jax.scipy.special import digamma, gammaln
    n, k = logit.shape
    alpha = jax.nn.relu(logit) + 1.0
    s = jnp.sum(alpha, axis=1, keepdims=True)
    one_hot_y = jnp.eye(k, dtype=jnp.float32)[label]
    loss_ce = jnp.sum((2.0 - prior) * one_hot_y *
                      (digamma(s) - digamma(alpha))) / n
    annealing_coef = jnp.minimum(
        jnp.float32(1.0), jnp.asarray(epoch_num / annealing_step, jnp.float32))
    kl_alpha = (alpha - 1.0) * (1.0 - one_hot_y) + 1.0
    s_kl = jnp.sum(kl_alpha, axis=1, keepdims=True)
    first = (gammaln(s_kl)
             - jnp.sum(gammaln(kl_alpha), axis=1, keepdims=True)
             - gammaln(jnp.float32(k)))
    second = jnp.sum((kl_alpha - 1.0) * (digamma(kl_alpha) - digamma(s_kl)),
                     axis=1, keepdims=True)
    loss_kl = annealing_coef * jnp.mean(first + second)
    loss_cor = jnp.sum(-k / s * one_hot_y * logit) / n
    return loss_ce + kl_weight * (loss_kl + loss_cor)


if __name__ == "__main__":
    key = jax.random.PRNGKey(0)
    k_logit, k_label = jax.random.split(key)

    N, K = 32, 4                       # batch=32 samples, 4 classes
    logit = 3.0 * jax.random.normal(k_logit, (N, K), dtype=jnp.float32)
    label = jax.random.randint(k_label, (N,), 0, K, dtype=jnp.int32)
    prior = jnp.full((K,), 1.0 / K, dtype=jnp.float32)
    epoch_num = 5

    loss = edl_loss(logit, label, epoch_num, prior)
    jax.block_until_ready(loss)

    ref = _edl_loss_ref(logit, label, epoch_num, prior)
    assert jnp.allclose(loss, ref, atol=2e-4, rtol=1e-4), (loss, ref)

    print("KERNEL_OK")
</pallas_src>

<mosaic_0001>
module attributes {stable_mosaic.version = 11 : i64} {
  func.func @_edl_loss_kernel(%arg0: i32, %arg1: memref<128x4xf32, #tpu.memory_space<vmem>>, %arg2: memref<128x1xi32, #tpu.memory_space<vmem>>, %arg3: memref<1x4xf32, #tpu.memory_space<vmem>>, %arg4: memref<1x8x128xf32, #tpu.memory_space<vmem>>) attributes {dimension_semantics = [#tpu.dimension_semantics<parallel>], iteration_bounds = array<i64: 1>, scalar_prefetch = 0 : i64, scratch_operands = 0 : i64, tpu.core_type = #tpu.core_type<tc>, window_params = [{transform_indices = @transform_0, window_bounds = array<i64: 128, 4>}, {transform_indices = @transform_1, window_bounds = array<i64: 128, 1>}, {pipeline_mode = #tpu.pipeline_mode<synchronous>, transform_indices = @transform_2, window_bounds = array<i64: 1, 4>}, {transform_indices = @transform_3, window_bounds = array<i64: 1, 8, 128>}]} {
    %c0 = arith.constant 0 : index
    %c0_0 = arith.constant 0 : index
    %0 = vector.load %arg1[%c0, %c0_0] : memref<128x4xf32, #tpu.memory_space<vmem>>, vector<128x4xf32>
    %c0_1 = arith.constant 0 : index
    %c0_2 = arith.constant 0 : index
    %1 = vector.load %arg2[%c0_1, %c0_2] : memref<128x1xi32, #tpu.memory_space<vmem>>, vector<128x1xi32>
    %c0_3 = arith.constant 0 : index
    %c0_4 = arith.constant 0 : index
    %2 = vector.load %arg3[%c0_3, %c0_4] : memref<1x4xf32, #tpu.memory_space<vmem>>, vector<1x4xf32>
    %3 = tpu.iota {dimensions = array<i32: 1>} : vector<128x4xi32>
    %4 = vector.broadcast %1 : vector<128x1xi32> to vector<128x4xi32>
    %5 = arith.cmpi eq, %4, %3 : vector<128x4xi32>
    %6 = arith.extui %5 : vector<128x4xi1> to vector<128x4xi32>
    %7 = arith.sitofp %6 : vector<128x4xi32> to vector<128x4xf32>
    %cst = arith.constant 0.000000e+00 : f32
    %8 = vector.broadcast %cst : f32 to vector<128x4xf32>
    %9 = arith.maximumf %0, %8 : vector<128x4xf32>
    %cst_5 = arith.constant 1.000000e+00 : f32
    %10 = vector.broadcast %cst_5 : f32 to vector<128x4xf32>
    %11 = arith.addf %9, %10 : vector<128x4xf32>
    %cst_6 = arith.constant dense<0.000000e+00> : vector<128xf32>
    %12 = vector.multi_reduction <add>, %11, %cst_6 [1] : vector<128x4xf32> to vector<128xf32>
    %13 = vector.shape_cast %12 : vector<128xf32> to vector<128x1xf32>
    %cst_7 = arith.constant 0.000000e+00 : f32
    %14 = vector.broadcast %cst_7 : f32 to vector<128x4xf32>
    %cst_8 = arith.constant 1.000000e+00 : f32
    %15 = vector.broadcast %cst_8 : f32 to vector<128x4xf32>
    %16 = arith.divf %15, %11 : vector<128x4xf32>
    %17 = arith.addf %14, %16 : vector<128x4xf32>
    %cst_9 = arith.constant 1.000000e+00 : f32
    %18 = vector.broadcast %cst_9 : f32 to vector<128x4xf32>
    %19 = arith.addf %11, %18 : vector<128x4xf32>
    %cst_10 = arith.constant 1.000000e+00 : f32
    %20 = vector.broadcast %cst_10 : f32 to vector<128x4xf32>
    %21 = arith.divf %20, %19 : vector<128x4xf32>
    %22 = arith.addf %17, %21 : vector<128x4xf32>
    %cst_11 = arith.constant 1.000000e+00 : f32
    %23 = vector.broadcast %cst_11 : f32 to vector<128x4xf32>
    %24 = arith.addf %19, %23 : vector<128x4xf32>
    %cst_12 = arith.constant 1.000000e+00 : f32
    %25 = vector.broadcast %cst_12 : f32 to vector<128x4xf32>
    %26 = arith.divf %25, %24 : vector<128x4xf32>
    %27 = arith.addf %22, %26 : vector<128x4xf32>
    %cst_13 = arith.constant 1.000000e+00 : f32
    %28 = vector.broadcast %cst_13 : f32 to vector<128x4xf32>
    %29 = arith.addf %24, %28 : vector<128x4xf32>
    %cst_14 = arith.constant 1.000000e+00 : f32
    %30 = vector.broadcast %cst_14 : f32 to vector<128x4xf32>
    %31 = arith.divf %30, %29 : vector<128x4xf32>
    %32 = arith.addf %27, %31 : vector<128x4xf32>
    %cst_15 = arith.constant 1.000000e+00 : f32
    %33 = vector.broadcast %cst_15 : f32 to vector<128x4xf32>
    %34 = arith.addf %29, %33 : vector<128x4xf32>
    %cst_16 = arith.constant 1.000000e+00 : f32
    %35 = vector.broadcast %cst_16 : f32 to vector<128x4xf32>
    %36 = arith.divf %35, %34 : vector<128x4xf32>
    %37 = arith.addf %32, %36 : vector<128x4xf32>
    %cst_17 = arith.constant 1.000000e+00 : f32
    %38 = vector.broadcast %cst_17 : f32 to vector<128x4xf32>
    %39 = arith.addf %34, %38 : vector<128x4xf32>
    %cst_18 = arith.constant 1.000000e+00 : f32
    %40 = vector.broadcast %cst_18 : f32 to vector<128x4xf32>
    %41 = arith.divf %40, %39 : vector<128x4xf32>
    %42 = arith.addf %37, %41 : vector<128x4xf32>
    %cst_19 = arith.constant 1.000000e+00 : f32
    %43 = vector.broadcast %cst_19 : f32 to vector<128x4xf32>
    %44 = arith.addf %39, %43 : vector<128x4xf32>
    %cst_20 = arith.constant 1.000000e+00 : f32
    %45 = vector.broadcast %cst_20 : f32 to vector<128x4xf32>
    %46 = arith.divf %45, %44 : vector<128x4xf32>
    %47 = arith.mulf %46, %46 : vector<128x4xf32>
    %cst_21 = arith.constant -5.000000e-01 : f32
    %48 = vector.broadcast %cst_21 : f32 to vector<128x4xf32>
    %49 = arith.mulf %48, %46 : vector<128x4xf32>
    %cst_22 = arith.constant 0.0039682542 : f32
    %50 = vector.broadcast %cst_22 : f32 to vector<128x4xf32>
    %51 = arith.mulf %47, %50 : vector<128x4xf32>
    %cst_23 = arith.constant 0.00833333377 : f32
    %52 = vector.broadcast %cst_23 : f32 to vector<128x4xf32>
    %53 = arith.subf %52, %51 : vector<128x4xf32>
    %54 = arith.mulf %47, %53 : vector<128x4xf32>
    %cst_24 = arith.constant 0.0833333358 : f32
    %55 = vector.broadcast %cst_24 : f32 to vector<128x4xf32>
    %56 = arith.subf %55, %54 : vector<128x4xf32>
    %57 = arith.mulf %47, %56 : vector<128x4xf32>
    %58 = arith.subf %49, %57 : vector<128x4xf32>
    %59 = math.log %44 : vector<128x4xf32>
    %60 = arith.addf %59, %58 : vector<128x4xf32>
    %61 = arith.subf %60, %42 : vector<128x4xf32>
    %cst_25 = arith.constant 0.000000e+00 : f32
    %62 = vector.broadcast %cst_25 : f32 to vector<128x1xf32>
    %cst_26 = arith.constant 1.000000e+00 : f32
    %63 = vector.broadcast %cst_26 : f32 to vector<128x1xf32>
    %64 = arith.divf %63, %13 : vector<128x1xf32>
    %65 = arith.addf %62, %64 : vector<128x1xf32>
    %cst_27 = arith.constant 1.000000e+00 : f32
    %66 = vector.broadcast %cst_27 : f32 to vector<128x1xf32>
    %67 = arith.addf %13, %66 : vector<128x1xf32>
    %cst_28 = arith.constant 1.000000e+00 : f32
    %68 = vector.broadcast %cst_28 : f32 to vector<128x1xf32>
    %69 = arith.divf %68, %67 : vector<128x1xf32>
    %70 = arith.addf %65, %69 : vector<128x1xf32>
    %cst_29 = arith.constant 1.000000e+00 : f32
    %71 = vector.broadcast %cst_29 : f32 to vector<128x1xf32>
    %72 = arith.addf %67, %71 : vector<128x1xf32>
    %cst_30 = arith.constant 1.000000e+00 : f32
    %73 = vector.broadcast %cst_30 : f32 to vector<128x1xf32>
    %74 = arith.divf %73, %72 : vector<128x1xf32>
    %75 = arith.addf %70, %74 : vector<128x1xf32>
    %cst_31 = arith.constant 1.000000e+00 : f32
    %76 = vector.broadcast %cst_31 : f32 to vector<128x1xf32>
    %77 = arith.addf %72, %76 : vector<128x1xf32>
    %cst_32 = arith.constant 1.000000e+00 : f32
    %78 = vector.broadcast %cst_32 : f32 to vector<128x1xf32>
    %79 = arith.divf %78, %77 : vector<128x1xf32>
    %80 = arith.addf %75, %79 : vector<128x1xf32>
    %cst_33 = arith.constant 1.000000e+00 : f32
    %81 = vector.broadcast %cst_33 : f32 to vector<128x1xf32>
    %82 = arith.addf %77, %81 : vector<128x1xf32>
    %cst_34 = arith.constant 1.000000e+00 : f32
    %83 = vector.broadcast %cst_34 : f32 to vector<128x1xf32>
    %84 = arith.divf %83, %82 : vector<128x1xf32>
    %85 = arith.addf %80, %84 : vector<128x1xf32>
    %cst_35 = arith.constant 1.000000e+00 : f32
    %86 = vector.broadcast %cst_35 : f32 to vector<128x1xf32>
    %87 = arith.addf %82, %86 : vector<128x1xf32>
    %cst_36 = arith.constant 1.000000e+00 : f32
    %88 = vector.broadcast %cst_36 : f32 to vector<128x1xf32>
    %89 = arith.divf %88, %87 : vector<128x1xf32>
    %90 = arith.addf %85, %89 : vector<128x1xf32>
    %cst_37 = arith.constant 1.000000e+00 : f32
    %91 = vector.broadcast %cst_37 : f32 to vector<128x1xf32>
    %92 = arith.addf %87, %91 : vector<128x1xf32>
    %cst_38 = arith.constant 1.000000e+00 : f32
    %93 = vector.broadcast %cst_38 : f32 to vector<128x1xf32>
    %94 = arith.divf %93, %92 : vector<128x1xf32>
    %95 = arith.mulf %94, %94 : vector<128x1xf32>
    %cst_39 = arith.constant -5.000000e-01 : f32
    %96 = vector.broadcast %cst_39 : f32 to vector<128x1xf32>
    %97 = arith.mulf %96, %94 : vector<128x1xf32>
    %cst_40 = arith.constant 0.0039682542 : f32
    %98 = vector.broadcast %cst_40 : f32 to vector<128x1xf32>
    %99 = arith.mulf %95, %98 : vector<128x1xf32>
    %cst_41 = arith.constant 0.00833333377 : f32
    %100 = vector.broadcast %cst_41 : f32 to vector<128x1xf32>
    %101 = arith.subf %100, %99 : vector<128x1xf32>
    %102 = arith.mulf %95, %101 : vector<128x1xf32>
    %cst_42 = arith.constant 0.0833333358 : f32
    %103 = vector.broadcast %cst_42 : f32 to vector<128x1xf32>
    %104 = arith.subf %103, %102 : vector<128x1xf32>
    %105 = arith.mulf %95, %104 : vector<128x1xf32>
    %106 = arith.subf %97, %105 : vector<128x1xf32>
    %107 = math.log %92 : vector<128x1xf32>
    %108 = arith.addf %107, %106 : vector<128x1xf32>
    %109 = arith.subf %108, %90 : vector<128x1xf32>
    %cst_43 = arith.constant 2.000000e+00 : f32
    %110 = vector.broadcast %cst_43 : f32 to vector<1x4xf32>
    %111 = arith.subf %110, %2 : vector<1x4xf32>
    %112 = vector.broadcast %111 : vector<1x4xf32> to vector<128x4xf32>
    %113 = arith.mulf %112, %7 : vector<128x4xf32>
    %114 = vector.broadcast %109 : vector<128x1xf32> to vector<128x4xf32>
    %115 = arith.subf %114, %61 : vector<128x4xf32>
    %116 = arith.mulf %113, %115 : vector<128x4xf32>
    %cst_44 = arith.constant dense<0.000000e+00> : vector<128xf32>
    %117 = vector.multi_reduction <add>, %116, %cst_44 [1] : vector<128x4xf32> to vector<128xf32>
    %118 = vector.shape_cast %117 : vector<128xf32> to vector<128x1xf32>
    %cst_45 = arith.constant 1.000000e+00 : f32
    %119 = vector.broadcast %cst_45 : f32 to vector<128x4xf32>
    %120 = arith.select %5, %119, %11 : vector<128x4xi1>, vector<128x4xf32>
    %cst_46 = arith.constant dense<0.000000e+00> : vector<128xf32>
    %121 = vector.multi_reduction <add>, %120, %cst_46 [1] : vector<128x4xf32> to vector<128xf32>
    %122 = vector.shape_cast %121 : vector<128xf32> to vector<128x1xf32>
    %cst_47 = arith.constant 0.000000e+00 : f32
    %123 = vector.broadcast %cst_47 : f32 to vector<128x1xf32>
    %124 = math.log %122 : vector<128x1xf32>
    %125 = arith.addf %123, %124 : vector<128x1xf32>
    %cst_48 = arith.constant 1.000000e+00 : f32
    %126 = vector.broadcast %cst_48 : f32 to vector<128x1xf32>
    %127 = arith.addf %122, %126 : vector<128x1xf32>
    %128 = math.log %127 : vector<128x1xf32>
    %129 = arith.addf %125, %128 : vector<128x1xf32>
    %cst_49 = arith.constant 1.000000e+00 : f32
    %130 = vector.broadcast %cst_49 : f32 to vector<128x1xf32>
    %131 = arith.addf %127, %130 : vector<128x1xf32>
    %132 = math.log %131 : vector<128x1xf32>
    %133 = arith.addf %129, %132 : vector<128x1xf32>
    %cst_50 = arith.constant 1.000000e+00 : f32
    %134 = vector.broadcast %cst_50 : f32 to vector<128x1xf32>
    %135 = arith.addf %131, %134 : vector<128x1xf32>
    %136 = math.log %135 : vector<128x1xf32>
    %137 = arith.addf %133, %136 : vector<128x1xf32>
    %cst_51 = arith.constant 1.000000e+00 : f32
    %138 = vector.broadcast %cst_51 : f32 to vector<128x1xf32>
    %139 = arith.addf %135, %138 : vector<128x1xf32>
    %140 = math.log %139 : vector<128x1xf32>
    %141 = arith.addf %137, %140 : vector<128x1xf32>
    %cst_52 = arith.constant 1.000000e+00 : f32
    %142 = vector.broadcast %cst_52 : f32 to vector<128x1xf32>
    %143 = arith.addf %139, %142 : vector<128x1xf32>
    %144 = math.log %143 : vector<128x1xf32>
    %145 = arith.addf %141, %144 : vector<128x1xf32>
    %cst_53 = arith.constant 1.000000e+00 : f32
    %146 = vector.broadcast %cst_53 : f32 to vector<128x1xf32>
    %147 = arith.addf %143, %146 : vector<128x1xf32>
    %cst_54 = arith.constant 1.000000e+00 : f32
    %148 = vector.broadcast %cst_54 : f32 to vector<128x1xf32>
    %149 = arith.divf %148, %147 : vector<128x1xf32>
    %150 = arith.mulf %149, %149 : vector<128x1xf32>
    %cst_55 = arith.constant 5.95238118E-4 : f32
    %151 = vector.broadcast %cst_55 : f32 to vector<128x1xf32>
    %152 = arith.mulf %150, %151 : vector<128x1xf32>
    %cst_56 = arith.constant 7.93650805E-4 : f32
    %153 = vector.broadcast %cst_56 : f32 to vector<128x1xf32>
    %154 = arith.subf %153, %152 : vector<128x1xf32>
    %155 = arith.mulf %150, %154 : vector<128x1xf32>
    %cst_57 = arith.constant -0.00277777785 : f32
    %156 = vector.broadcast %cst_57 : f32 to vector<128x1xf32>
    %157 = arith.addf %156, %155 : vector<128x1xf32>
    %158 = arith.mulf %150, %157 : vector<128x1xf32>
    %cst_58 = arith.constant 0.0833333358 : f32
    %159 = vector.broadcast %cst_58 : f32 to vector<128x1xf32>
    %160 = arith.addf %159, %158 : vector<128x1xf32>
    %161 = arith.mulf %149, %160 : vector<128x1xf32>
    %cst_59 = arith.constant 5.000000e-01 : f32
    %162 = vector.broadcast %cst_59 : f32 to vector<128x1xf32>
    %163 = arith.subf %147, %162 : vector<128x1xf32>
    %164 = math.log %147 : vector<128x1xf32>
    %165 = arith.mulf %163, %164 : vector<128x1xf32>
    %166 = arith.subf %165, %147 : vector<128x1xf32>
    %cst_60 = arith.constant 0.918938517 : f32
    %167 = vector.broadcast %cst_60 : f32 to vector<128x1xf32>
    %168 = arith.addf %166, %167 : vector<128x1xf32>
    %169 = arith.addf %168, %161 : vector<128x1xf32>
    %170 = arith.subf %169, %145 : vector<128x1xf32>
    %cst_61 = arith.constant 0.000000e+00 : f32
    %171 = vector.broadcast %cst_61 : f32 to vector<128x4xf32>
    %172 = math.log %120 : vector<128x4xf32>
    %173 = arith.addf %171, %172 : vector<128x4xf32>
    %cst_62 = arith.constant 1.000000e+00 : f32
    %174 = vector.broadcast %cst_62 : f32 to vector<128x4xf32>
    %175 = arith.addf %120, %174 : vector<128x4xf32>
    %176 = math.log %175 : vector<128x4xf32>
    %177 = arith.addf %173, %176 : vector<128x4xf32>
    %cst_63 = arith.constant 1.000000e+00 : f32
    %178 = vector.broadcast %cst_63 : f32 to vector<128x4xf32>
    %179 = arith.addf %175, %178 : vector<128x4xf32>
    %180 = math.log %179 : vector<128x4xf32>
    %181 = arith.addf %177, %180 : vector<128x4xf32>
    %cst_64 = arith.constant 1.000000e+00 : f32
    %182 = vector.broadcast %cst_64 : f32 to vector<128x4xf32>
    %183 = arith.addf %179, %182 : vector<128x4xf32>
    %184 = math.log %183 : vector<128x4xf32>
    %185 = arith.addf %181, %184 : vector<128x4xf32>
    %cst_65 = arith.constant 1.000000e+00 : f32
    %186 = vector.broadcast %cst_65 : f32 to vector<128x4xf32>
    %187 = arith.addf %183, %186 : vector<128x4xf32>
    %188 = math.log %187 : vector<128x4xf32>
    %189 = arith.addf %185, %188 : vector<128x4xf32>
    %cst_66 = arith.constant 1.000000e+00 : f32
    %190 = vector.broadcast %cst_66 : f32 to vector<128x4xf32>
    %191 = arith.addf %187, %190 : vector<128x4xf32>
    %192 = math.log %191 : vector<128x4xf32>
    %193 = arith.addf %189, %192 : vector<128x4xf32>
    %cst_67 = arith.constant 1.000000e+00 : f32
    %194 = vector.broadcast %cst_67 : f32 to vector<128x4xf32>
    %195 = arith.addf %191, %194 : vector<128x4xf32>
    %cst_68 = arith.constant 1.000000e+00 : f32
    %196 = vector.broadcast %cst_68 : f32 to vector<128x4xf32>
    %197 = arith.divf %196, %195 : vector<128x4xf32>
    %198 = arith.mulf %197, %197 : vector<128x4xf32>
    %cst_69 = arith.constant 5.95238118E-4 : f32
    %199 = vector.broadcast %cst_69 : f32 to vector<128x4xf32>
    %200 = arith.mulf %198, %199 : vector<128x4xf32>
    %cst_70 = arith.constant 7.93650805E-4 : f32
    %201 = vector.broadcast %cst_70 : f32 to vector<128x4xf32>
    %202 = arith.subf %201, %200 : vector<128x4xf32>
    %203 = arith.mulf %198, %202 : vector<128x4xf32>
    %cst_71 = arith.constant -0.00277777785 : f32
    %204 = vector.broadcast %cst_71 : f32 to vector<128x4xf32>
    %205 = arith.addf %204, %203 : vector<128x4xf32>
    %206 = arith.mulf %198, %205 : vector<128x4xf32>
    %cst_72 = arith.constant 0.0833333358 : f32
    %207 = vector.broadcast %cst_72 : f32 to vector<128x4xf32>
    %208 = arith.addf %207, %206 : vector<128x4xf32>
    %209 = arith.mulf %197, %208 : vector<128x4xf32>
    %cst_73 = arith.constant 5.000000e-01 : f32
    %210 = vector.broadcast %cst_73 : f32 to vector<128x4xf32>
    %211 = arith.subf %195, %210 : vector<128x4xf32>
    %212 = math.log %195 : vector<128x4xf32>
    %213 = arith.mulf %211, %212 : vector<128x4xf32>
    %214 = arith.subf %213, %195 : vector<128x4xf32>
    %cst_74 = arith.constant 0.918938517 : f32
    %215 = vector.broadcast %cst_74 : f32 to vector<128x4xf32>
    %216 = arith.addf %214, %215 : vector<128x4xf32>
    %217 = arith.addf %216, %209 : vector<128x4xf32>
    %218 = arith.subf %217, %193 : vector<128x4xf32>
    %cst_75 = arith.constant dense<0.000000e+00> : vector<128xf32>
    %219 = vector.multi_reduction <add>, %218, %cst_75 [1] : vector<128x4xf32> to vector<128xf32>
    %220 = vector.shape_cast %219 : vector<128xf32> to vector<128x1xf32>
    %221 = arith.subf %170, %220 : vector<128x1xf32>
    %cst_76 = arith.constant 1.79175949 : f32
    %222 = vector.broadcast %cst_76 : f32 to vector<128x1xf32>
    %223 = arith.subf %221, %222 : vector<128x1xf32>
    %cst_77 = arith.constant 1.000000e+00 : f32
    %224 = vector.broadcast %cst_77 : f32 to vector<128x4xf32>
    %225 = arith.subf %120, %224 : vector<128x4xf32>
    %cst_78 = arith.constant 0.000000e+00 : f32
    %226 = vector.broadcast %cst_78 : f32 to vector<128x4xf32>
    %cst_79 = arith.constant 1.000000e+00 : f32
    %227 = vector.broadcast %cst_79 : f32 to vector<128x4xf32>
    %228 = arith.divf %227, %120 : vector<128x4xf32>
    %229 = arith.addf %226, %228 : vector<128x4xf32>
    %cst_80 = arith.constant 1.000000e+00 : f32
    %230 = vector.broadcast %cst_80 : f32 to vector<128x4xf32>
    %231 = arith.addf %120, %230 : vector<128x4xf32>
    %cst_81 = arith.constant 1.000000e+00 : f32
    %232 = vector.broadcast %cst_81 : f32 to vector<128x4xf32>
    %233 = arith.divf %232, %231 : vector<128x4xf32>
    %234 = arith.addf %229, %233 : vector<128x4xf32>
    %cst_82 = arith.constant 1.000000e+00 : f32
    %235 = vector.broadcast %cst_82 : f32 to vector<128x4xf32>
    %236 = arith.addf %231, %235 : vector<128x4xf32>
    %cst_83 = arith.constant 1.000000e+00 : f32
    %237 = vector.broadcast %cst_83 : f32 to vector<128x4xf32>
    %238 = arith.divf %237, %236 : vector<128x4xf32>
    %239 = arith.addf %234, %238 : vector<128x4xf32>
    %cst_84 = arith.constant 1.000000e+00 : f32
    %240 = vector.broadcast %cst_84 : f32 to vector<128x4xf32>
    %241 = arith.addf %236, %240 : vector<128x4xf32>
    %cst_85 = arith.constant 1.000000e+00 : f32
    %242 = vector.broadcast %cst_85 : f32 to vector<128x4xf32>
    %243 = arith.divf %242, %241 : vector<128x4xf32>
    %244 = arith.addf %239, %243 : vector<128x4xf32>
    %cst_86 = arith.constant 1.000000e+00 : f32
    %245 = vector.broadcast %cst_86 : f32 to vector<128x4xf32>
    %246 = arith.addf %241, %245 : vector<128x4xf32>
    %cst_87 = arith.constant 1.000000e+00 : f32
    %247 = vector.broadcast %cst_87 : f32 to vector<128x4xf32>
    %248 = arith.divf %247, %246 : vector<128x4xf32>
    %249 = arith.addf %244, %248 : vector<128x4xf32>
    %cst_88 = arith.constant 1.000000e+00 : f32
    %250 = vector.broadcast %cst_88 : f32 to vector<128x4xf32>
    %251 = arith.addf %246, %250 : vector<128x4xf32>
    %cst_89 = arith.constant 1.000000e+00 : f32
    %252 = vector.broadcast %cst_89 : f32 to vector<128x4xf32>
    %253 = arith.divf %252, %251 : vector<128x4xf32>
    %254 = arith.addf %249, %253 : vector<128x4xf32>
    %cst_90 = arith.constant 1.000000e+00 : f32
    %255 = vector.broadcast %cst_90 : f32 to vector<128x4xf32>
    %256 = arith.addf %251, %255 : vector<128x4xf32>
    %cst_91 = arith.constant 1.000000e+00 : f32
    %257 = vector.broadcast %cst_91 : f32 to vector<128x4xf32>
    %258 = arith.divf %257, %256 : vector<128x4xf32>
    %259 = arith.mulf %258, %258 : vector<128x4xf32>
    %cst_92 = arith.constant -5.000000e-01 : f32
    %260 = vector.broadcast %cst_92 : f32 to vector<128x4xf32>
    %261 = arith.mulf %260, %258 : vector<128x4xf32>
    %cst_93 = arith.constant 0.0039682542 : f32
    %262 = vector.broadcast %cst_93 : f32 to vector<128x4xf32>
    %263 = arith.mulf %259, %262 : vector<128x4xf32>
    %cst_94 = arith.constant 0.00833333377 : f32
    %264 = vector.broadcast %cst_94 : f32 to vector<128x4xf32>
    %265 = arith.subf %264, %263 : vector<128x4xf32>
    %266 = arith.mulf %259, %265 : vector<128x4xf32>
    %cst_95 = arith.constant 0.0833333358 : f32
    %267 = vector.broadcast %cst_95 : f32 to vector<128x4xf32>
    %268 = arith.subf %267, %266 : vector<128x4xf32>
    %269 = arith.mulf %259, %268 : vector<128x4xf32>
    %270 = arith.subf %261, %269 : vector<128x4xf32>
    %271 = math.log %256 : vector<128x4xf32>
    %272 = arith.addf %271, %270 : vector<128x4xf32>
    %273 = arith.subf %272, %254 : vector<128x4xf32>
    %cst_96 = arith.constant 0.000000e+00 : f32
    %274 = vector.broadcast %cst_96 : f32 to vector<128x1xf32>
    %cst_97 = arith.constant 1.000000e+00 : f32
    %275 = vector.broadcast %cst_97 : f32 to vector<128x1xf32>
    %276 = arith.divf %275, %122 : vector<128x1xf32>
    %277 = arith.addf %274, %276 : vector<128x1xf32>
    %cst_98 = arith.constant 1.000000e+00 : f32
    %278 = vector.broadcast %cst_98 : f32 to vector<128x1xf32>
    %279 = arith.addf %122, %278 : vector<128x1xf32>
    %cst_99 = arith.constant 1.000000e+00 : f32
    %280 = vector.broadcast %cst_99 : f32 to vector<128x1xf32>
    %281 = arith.divf %280, %279 : vector<128x1xf32>
    %282 = arith.addf %277, %281 : vector<128x1xf32>
    %cst_100 = arith.constant 1.000000e+00 : f32
    %283 = vector.broadcast %cst_100 : f32 to vector<128x1xf32>
    %284 = arith.addf %279, %283 : vector<128x1xf32>
    %cst_101 = arith.constant 1.000000e+00 : f32
    %285 = vector.broadcast %cst_101 : f32 to vector<128x1xf32>
    %286 = arith.divf %285, %284 : vector<128x1xf32>
    %287 = arith.addf %282, %286 : vector<128x1xf32>
    %cst_102 = arith.constant 1.000000e+00 : f32
    %288 = vector.broadcast %cst_102 : f32 to vector<128x1xf32>
    %289 = arith.addf %284, %288 : vector<128x1xf32>
    %cst_103 = arith.constant 1.000000e+00 : f32
    %290 = vector.broadcast %cst_103 : f32 to vector<128x1xf32>
    %291 = arith.divf %290, %289 : vector<128x1xf32>
    %292 = arith.addf %287, %291 : vector<128x1xf32>
    %cst_104 = arith.constant 1.000000e+00 : f32
    %293 = vector.broadcast %cst_104 : f32 to vector<128x1xf32>
    %294 = arith.addf %289, %293 : vector<128x1xf32>
    %cst_105 = arith.constant 1.000000e+00 : f32
    %295 = vector.broadcast %cst_105 : f32 to vector<128x1xf32>
    %296 = arith.divf %295, %294 : vector<128x1xf32>
    %297 = arith.addf %292, %296 : vector<128x1xf32>
    %cst_106 = arith.constant 1.000000e+00 : f32
    %298 = vector.broadcast %cst_106 : f32 to vector<128x1xf32>
    %299 = arith.addf %294, %298 : vector<128x1xf32>
    %cst_107 = arith.constant 1.000000e+00 : f32
    %300 = vector.broadcast %cst_107 : f32 to vector<128x1xf32>
    %301 = arith.divf %300, %299 : vector<128x1xf32>
    %302 = arith.addf %297, %301 : vector<128x1xf32>
    %cst_108 = arith.constant 1.000000e+00 : f32
    %303 = vector.broadcast %cst_108 : f32 to vector<128x1xf32>
    %304 = arith.addf %299, %303 : vector<128x1xf32>
    %cst_109 = arith.constant 1.000000e+00 : f32
    %305 = vector.broadcast %cst_109 : f32 to vector<128x1xf32>
    %306 = arith.divf %305, %304 : vector<128x1xf32>
    %307 = arith.mulf %306, %306 : vector<128x1xf32>
    %cst_110 = arith.constant -5.000000e-01 : f32
    %308 = vector.broadcast %cst_110 : f32 to vector<128x1xf32>
    %309 = arith.mulf %308, %306 : vector<128x1xf32>
    %cst_111 = arith.constant 0.0039682542 : f32
    %310 = vector.broadcast %cst_111 : f32 to vector<128x1xf32>
    %311 = arith.mulf %307, %310 : vector<128x1xf32>
    %cst_112 = arith.constant 0.00833333377 : f32
    %312 = vector.broadcast %cst_112 : f32 to vector<128x1xf32>
    %313 = arith.subf %312, %311 : vector<128x1xf32>
    %314 = arith.mulf %307, %313 : vector<128x1xf32>
    %cst_113 = arith.constant 0.0833333358 : f32
    %315 = vector.broadcast %cst_113 : f32 to vector<128x1xf32>
    %316 = arith.subf %315, %314 : vector<128x1xf32>
    %317 = arith.mulf %307, %316 : vector<128x1xf32>
    %318 = arith.subf %309, %317 : vector<128x1xf32>
    %319 = math.log %304 : vector<128x1xf32>
    %320 = arith.addf %319, %318 : vector<128x1xf32>
    %321 = arith.subf %320, %302 : vector<128x1xf32>
    %322 = vector.broadcast %321 : vector<128x1xf32> to vector<128x4xf32>
    %323 = arith.subf %273, %322 : vector<128x4xf32>
    %324 = arith.mulf %225, %323 : vector<128x4xf32>
    %cst_114 = arith.constant dense<0.000000e+00> : vector<128xf32>
    %325 = vector.multi_reduction <add>, %324, %cst_114 [1] : vector<128x4xf32> to vector<128xf32>
    %326 = vector.shape_cast %325 : vector<128xf32> to vector<128x1xf32>
    %327 = arith.addf %223, %326 : vector<128x1xf32>
    %cst_115 = arith.constant -4.000000e+00 : f32
    %328 = vector.broadcast %cst_115 : f32 to vector<128x1xf32>
    %329 = arith.divf %328, %13 : vector<128x1xf32>
    %330 = vector.broadcast %329 : vector<128x1xf32> to vector<128x4xf32>
    %331 = arith.mulf %330, %7 : vector<128x4xf32>
    %332 = arith.mulf %331, %0 : vector<128x4xf32>
    %cst_116 = arith.constant dense<0.000000e+00> : vector<128xf32>
    %333 = vector.multi_reduction <add>, %332, %cst_116 [1] : vector<128x4xf32> to vector<128xf32>
    %334 = vector.shape_cast %333 : vector<128xf32> to vector<128x1xf32>
    %c128_i32 = arith.constant 128 : i32
    %335 = arith.muli %arg0, %c128_i32 : i32
    %336 = tpu.iota {dimensions = array<i32: 0>} : vector<128x1xi32>
    %337 = vector.broadcast %335 : i32 to vector<128x1xi32>
    %338 = arith.addi %337, %336 : vector<128x1xi32>
    %c32_i32 = arith.constant 32 : i32
    %339 = vector.broadcast %c32_i32 : i32 to vector<128x1xi32>
    %340 = arith.cmpi slt, %338, %339 : vector<128x1xi32>
    %cst_117 = arith.constant 0.000000e+00 : f32
    %341 = vector.broadcast %cst_117 : f32 to vector<128x1xf32>
    %342 = arith.select %340, %118, %341 : vector<128x1xi1>, vector<128x1xf32>
    %343 = vector.shape_cast %342 : vector<128x1xf32> to vector<1x128x1xf32>
    %cst_118 = arith.constant dense<0.000000e+00> : vector<1xf32>
    %344 = vector.multi_reduction <add>, %343, %cst_118 [1, 2] : vector<1x128x1xf32> to vector<1xf32>
    %345 = vector.shape_cast %344 : vector<1xf32> to vector<1x1x1xf32>
    %346 = vector.extract %345[0, 0, 0] : f32 from vector<1x1x1xf32>
    %cst_119 = arith.constant 0.000000e+00 : f32
    %347 = vector.broadcast %cst_119 : f32 to vector<128x1xf32>
    %348 = arith.select %340, %327, %347 : vector<128x1xi1>, vector<128x1xf32>
    %349 = vector.shape_cast %348 : vector<128x1xf32> to vector<1x128x1xf32>
    %cst_120 = arith.constant dense<0.000000e+00> : vector<1xf32>
    %350 = vector.multi_reduction <add>, %349, %cst_120 [1, 2] : vector<1x128x1xf32> to vector<1xf32>
    %351 = vector.shape_cast %350 : vector<1xf32> to vector<1x1x1xf32>
    %352 = vector.extract %351[0, 0, 0] : f32 from vector<1x1x1xf32>
    %cst_121 = arith.constant 0.000000e+00 : f32
    %353 = vector.broadcast %cst_121 : f32 to vector<128x1xf32>
    %354 = arith.select %340, %334, %353 : vector<128x1xi1>, vector<128x1xf32>
    %355 = vector.shape_cast %354 : vector<128x1xf32> to vector<1x128x1xf32>
    %cst_122 = arith.constant dense<0.000000e+00> : vector<1xf32>
    %356 = vector.multi_reduction <add>, %355, %cst_122 [1, 2] : vector<1x128x1xf32> to vector<1xf32>
    %357 = vector.shape_cast %356 : vector<1xf32> to vector<1x1x1xf32>
    %358 = vector.extract %357[0, 0, 0] : f32 from vector<1x1x1xf32>
    %359 = tpu.iota {dimensions = array<i32: 1>} : vector<1x8x128xi32>
    %360 = tpu.iota {dimensions = array<i32: 2>} : vector<1x8x128xi32>
    %c0_i32 = arith.constant 0 : i32
    %361 = vector.broadcast %c0_i32 : i32 to vector<1x8x128xi32>
    %362 = arith.cmpi eq, %359, %361 : vector<1x8x128xi32>
    %c0_i32_123 = arith.constant 0 : i32
    %363 = vector.broadcast %c0_i32_123 : i32 to vector<1x8x128xi32>
    %364 = arith.cmpi eq, %360, %363 : vector<1x8x128xi32>
    %365 = arith.andi %362, %364 : vector<1x8x128xi1>
    %cst_124 = arith.constant 0.000000e+00 : f32
    %366 = vector.broadcast %346 : f32 to vector<1x8x128xf32>
    %367 = vector.broadcast %cst_124 : f32 to vector<1x8x128xf32>
    %368 = arith.select %365, %366, %367 : vector<1x8x128xi1>, vector<1x8x128xf32>
    %c1_i32 = arith.constant 1 : i32
    %369 = vector.broadcast %c1_i32 : i32 to vector<1x8x128xi32>
    %370 = arith.cmpi eq, %360, %369 : vector<1x8x128xi32>
    %371 = arith.andi %362, %370 : vector<1x8x128xi1>
    %372 = vector.broadcast %352 : f32 to vector<1x8x128xf32>
    %373 = arith.select %371, %372, %368 : vector<1x8x128xi1>, vector<1x8x128xf32>
    %c2_i32 = arith.constant 2 : i32
    %374 = vector.broadcast %c2_i32 : i32 to vector<1x8x128xi32>
    %375 = arith.cmpi eq, %360, %374 : vector<1x8x128xi32>
    %376 = arith.andi %362, %375 : vector<1x8x128xi1>
    %377 = vector.broadcast %358 : f32 to vector<1x8x128xf32>
    %378 = arith.select %376, %377, %373 : vector<1x8x128xi1>, vector<1x8x128xf32>
    %c0_125 = arith.constant 0 : index
    %c0_126 = arith.constant 0 : index
    %c0_127 = arith.constant 0 : index
    %379 = vector.load %arg4[%c0_125, %c0_126, %c0_127] : memref<1x8x128xf32, #tpu.memory_space<vmem>>, vector<1x8x128xf32>
    tpu.vector_store %arg4[%c0_125, %c0_126, %c0_127], %378 {strides = array<i32>} : memref<1x8x128xf32, #tpu.memory_space<vmem>>, vector<1x8x128xf32>,
    return
  }
  func.func @transform_0(%arg0: i32) -> (i32, i32) {
    %c0_i32 = arith.constant 0 : i32
    %c0_i32_0 = arith.constant 0 : i32
    return %arg0, %c0_i32 : i32, i32
  }
  func.func @transform_1(%arg0: i32) -> (i32, i32) {
    %c0_i32 = arith.constant 0 : i32
    %c0_i32_0 = arith.constant 0 : i32
    return %arg0, %c0_i32 : i32, i32
  }
  func.func @transform_2(%arg0: i32) -> (i32, i32) {
    %c0_i32 = arith.constant 0 : i32
    %c0_i32_0 = arith.constant 0 : i32
    %c0_i32_1 = arith.constant 0 : i32
    return %c0_i32, %c0_i32_0 : i32, i32
  }
  func.func @transform_3(%arg0: i32) -> (i32, i32, i32) {
    %c0_i32 = arith.constant 0 : i32
    %c0_i32_0 = arith.constant 0 : i32
    %c0_i32_1 = arith.constant 0 : i32
    return %arg0, %c0_i32, %c0_i32_0 : i32, i32, i32
  }
}

</mosaic_0001>

<bundles_post_ra>
// kernel: tpu_custom_call.1
= control target key start
LH: loop header
LB: loop body
LE: loop exit
PB: predicated region body
PF: predicated region fallthrough
CT: control target
= control target key end

     0   :  { %v4823_v2 = vmov 0   ;;  %s5784_s0 = inlined_call_operand.vmem [shape: f32[128,4], index: 0, kind: input, shape index: {}]   ;;  %s5785_s1 = inlined_call_operand.vmem [shape: s32[128,1], index: 1, kind: input, shape index: {}]   ;;  %s5786_s2 = inlined_call_operand.vmem [shape: f32[1,4], index: 2, kind: input, shape index: {}]   ;;  %s5787_s3 = inlined_call_operand.hbm [shape: f32[1,8,128], index: 3, kind: output, shape index: {}]  }
   0x1   :  { %v33_v0 = vld [vmem:[%s5785_s1 + $0x10] sm:$0xff]  ;;  %v31_v1 = vld [vmem:[%s5785_s1] sm:$0xff]  ;;  %4444 = vset.pattern.permute.xlu1 %v4823_v2  ;;  %4443 = vset.pattern.permute.xlu0 %v4823_v2  ;;  %v34_v3 = vld [vmem:[%s5785_s1 + $0x18] sm:$0xff] }
   0x2   :  { %57 = vperm.xlu1 %4444, %v33_v0   ;;  %51 = vperm.xlu0 %4443, %v31_v1   ;;  %v32_v4 = vld [vmem:[%s5785_s1 + $0x8] sm:$0xff] }
   0x3   :  { %8 = vsyncpa [#allocation3], 0  ;;  %v4861_v5 = vld [vmem:[%s5784_s0] sm:$0xff]  ;;  %v4867_v7 = vld [vmem:[%s5784_s0 + $0x8] sm:$0xff]  ;;  %vm178_vm0 = vcmask 31744   ;;  %v48_v21 = vlaneseq  ;;  %v4824_v45 = vmov 0.0  }
   0x4   :  { %v146_v6 = vmax.f32 %v4861_v5, 0.0  ;;  %v147_v9 = vmax.f32 %v4867_v7, 0.0  ;;  %v17_v23 = vld [vmem:[%s5784_s0 + $0x10] sm:$0xff]  ;;  %v47_v27 = vld [vmem:[%s5786_s2] sm:$0x1]  ;;  %v18_v30 = vld [vmem:[%s5784_s0 + $0x18] sm:$0xff] }
   0x5   :  { %v4880_v25 = vshrl.u32 %v48_v21, 7  ;;  %v148_v28 = vmax.f32 %v17_v23, 0.0  ;;  %v4885_v29 = vand.u32 127, %v48_v21  ;;  %v1443_v32 = vsub.f32 2.0, %v47_v27  ;;  %s4825_s6 = smov [#allocation2]  }
   0x6   :  { %60 = vperm.xlu1 %4444, %v34_v3   ;;  %54 = vperm.xlu0 %4443, %v32_v4   ;;  %v162_v8 = vadd.f32 1.0, %v146_v6  ;;  %v4871_v11 = vadd.f32 1.0, %v147_v9  ;;  %v149_v38 = vmax.f32 %v18_v30, 0.0  ;;  %vm4173_vm5 = vcmask 7168   ;;  %s4346_s7 = sshll.u32 %s4825_s6, 4  ;;  %s4347_s7 = int_to_ptr.vmem [resolvable:$true] %s4346_s7 }
   0x7   :  { %5809 = vst [vmem:[#allocation5_spill] sm:$0xff] %v4880_v25  ;;  %5810 = vst [vmem:[#allocation6_spill] sm:$0xff] %v4885_v29  ;;  %v1447_v33 = vsub.s32 0, %v4880_v25  ;;  %v4895_v36 = vadd.f32 1.0, %v148_v28  ;;  %s4799_s9 = scalar_lea.vmem %s4347_s7, 128  ;;  %p4804_p1 = scmp.lt.s32.totalorder %s4347_s7, %s4347_s7 }
   0x8   :  { %v179_v10 = vsel %vm178_vm0, %v162_v8, 0.0  ;;  %v182_v12 = vsel %vm178_vm0, %v4871_v11, 0.0  ;;  %v275_v13 = vadd.f32 1.0, %v162_v8  ;;  %v276_v15 = vadd.f32 1.0, %v4871_v11  ;;  %p4800_p0 = scmp.ne.s32.totalorder %s4347_s7, %s4799_s9  ;;  %p4805_p2 = scmp.lt.s32.totalorder %s4799_s9, %s4799_s9 }
   0x9   :  { %4445 = vrcp.f32 %v162_v8  ;;  %5811 = vst [vmem:[#allocation7_spill] sm:$0xff] %v4895_v36  ;;  %v4905_v43 = vrot.slane %v1443_v32, %v1447_v33  ;;  %v4931_v52 = vadd.f32 1.0, %v149_v38  ;;  %v185_v63 = vsel %vm178_vm0, %v4895_v36, 0.0 }
   0xa   :  { %v339_v14 = vadd.f32 1.0, %v275_v13  ;;  %v340_v17 = vadd.f32 1.0, %v276_v15  ;;  %4447 = vrcp.f32 %v4871_v11  ;;  %p4806_p3 = por %p4805_p2, %p4804_p1 }
   0xb   :  { %4449 = vrcp.f32 %v275_v13  ;;  %5812 = vst [vmem:[#allocation8_spill] sm:$0xff] %v4905_v43  ;;  %5817 = vst [vmem:[#allocation13_spill] sm:$0xff] %v4931_v52  ;;  %v188_v9 = vsel %vm178_vm0, %v4931_v52, 0.0 }
   0xc   :  { %v403_v16 = vadd.f32 1.0, %v339_v14  ;;  %v404_v19 = vadd.f32 1.0, %v340_v17  ;;  %4451 = vrcp.f32 %v276_v15  ;;  %p4807_p4 = pnand %p4806_p3, %p4800_p0 }
   0xd   :  { %4453 = vrcp.f32 %v339_v14 }
   0xe   :  { %v467_v18 = vadd.f32 1.0, %v403_v16  ;;  %v468_v22 = vadd.f32 1.0, %v404_v19  ;;  %4455 = vrcp.f32 %v340_v17 }
   0xf   :  { %4457 = vrcp.f32 %v403_v16 }
  0x10   :  { %v531_v20 = vadd.f32 1.0, %v467_v18  ;;  %v532_v26 = vadd.f32 1.0, %v468_v22  ;;  %4459 = vrcp.f32 %v404_v19 }
  0x11   :  { %4461 = vrcp.f32 %v467_v18 }
  0x12   :  { %v595_v24 = vadd.f32 1.0, %v531_v20  ;;  %v596_v34 = vadd.f32 1.0, %v532_v26 }
  0x13   :  { %v4890_v31 = vpop.eup %4445 }
  0x14   :  { %4463 = vrcp.f32 %v595_v24  ;;  %v4893_v35 = vpop.eup %4447 }
  0x15   :  { %4465 = vrcp.f32 %v468_v22  ;;  %v4897_v37 = vpop.eup %4449 }
  0x16   :  { %4467 = vrcp.f32 %v531_v20  ;;  %v4899_v39 = vpop.eup %4451  ;;  %v323_v18 = vadd.f32 %v4897_v37, %v4890_v31 }
  0x17   :  { %4469 = vrcp.f32 %v532_v26  ;;  %v4903_v42 = vpop.eup %4453  ;;  %v324_v21 = vadd.f32 %v4899_v39, %v4893_v35 }
  0x18   :  { %4471 = vlog2.f32 %v595_v24  ;;  %v4910_v44 = vpop.eup %4455  ;;  %v387_v28 = vadd.f32 %v4903_v42, %v323_v18 }
  0x19   :  { %4473 = vrcp.f32 %v596_v34  ;;  %v4923_v49 = vpop.eup %4457  ;;  %v388_v32 = vadd.f32 %v4910_v44, %v324_v21 }
  0x1a   :  { %4475 = vlog2.f32 %v596_v34  ;;  %v4933_v53 = vpop.eup %4459  ;;  %v451_v42 = vadd.f32 %v4923_v49, %v387_v28 }
  0x1b   :  { %v4941_v58 = vpop.eup %4461 }
  0x1e   :  { %v4948_v60 = vpop.eup %4463 }
  0x1f   :  { %v4957_v0 = vpop.eup %4465 }
  0x20   :  { %v4970_v4 = vpop.eup %4467 }
  0x25   :  { %180 = vadd.xlane.f32.xlu0 %v179_v10  ;;  %v4986_v10 = vmul.f32 %v4948_v60, %v4948_v60 }
  0x27   :  { %v675_v20 = vmul.f32 0.003968254, %v4986_v10 }
  0x29   :  { %183 = vadd.xlane.f32.xlu0 %v182_v12  ;;  %v691_v31 = vsub.f32 0.008333334, %v675_v20  ;;  %v515_v20 = vadd.f32 %v4941_v58, %v451_v42 }
  0x81   :  { %v58_v40 = vpop.permute.xlu1 %57  ;;  %v4901_v41 = vpop.permute.xlu0 %51 }
  0x82   :  { %vm100_vm1 = vcmp.eq.s32.totalorder %v58_v40, %v4885_v29  ;;  %vm98_vm2 = vcmp.eq.s32.totalorder %v4901_v41, %v4885_v29 }
  0x83   :  { %v4913_v46 = vsel %vm100_vm1, 1.0, %v4824_v45  ;;  %v4916_v47 = vsel %vm100_vm1, 1.0, %v4895_v36  ;;  %v4921_v48 = vsel %vm98_vm2, 1.0, %v162_v8  ;;  %v4979_v8 = vpop.eup %4469 }
  0x84   :  { %5813 = vst [vmem:[#allocation9_spill] sm:$0xff] %v4913_v46  ;;  %5814 = vst [vmem:[#allocation10_spill] sm:$0xff] %v4916_v47  ;;  %v4927_v50 = vmul.f32 %v4913_v46, %v4905_v43  ;;  %4477 = vlog2.f32 %v4916_v47  ;;  %v2332_v51 = vadd.f32 1.0, %v4916_v47  ;;  %v2330_v54 = vadd.f32 1.0, %v4921_v48  ;;  %v4988_v12 = vpop.eup %4471 }
  0x85   :  { %5815 = vst [vmem:[#allocation11_spill] sm:$0xff] %v4921_v48  ;;  %4479 = vrcp.f32 %v4916_v47  ;;  %v61_v55 = vpop.permute.xlu1 %60  ;;  %v4937_v56 = vpop.permute.xlu0 %54  ;;  %v1562_v57 = vsel %vm178_vm0, %v4921_v48, 0.0  ;;  %v1568_v17 = vsel %vm178_vm0, %v4916_v47, 0.0 }
  0x86   :  { %5816 = vst [vmem:[#allocation12_spill] sm:$0xff] %v4927_v50  ;;  %4481 = vlog2.f32 %v2332_v51  ;;  %v4943_v59 = vadd.f32 1.0, %v2332_v51  ;;  %vm101_vm3 = vcmp.eq.s32.totalorder %v61_v55, %v4885_v29  ;;  %vm99_vm4 = vcmp.eq.s32.totalorder %v4937_v56, %v4885_v29  ;;  %1563 = vadd.xlane.f32.xlu0 %v1562_v57  ;;  %v4996_v15 = vpop.eup %4473 }
  0x87   :  { %4483 = vrcp.f32 %v2332_v51  ;;  %v4950_v61 = vadd.f32 1.0, %v2330_v54  ;;  %v4953_v62 = vsel %vm101_vm3, 1.0, %v4824_v45  ;;  %v4968_v3 = vsel %vm101_vm3, 1.0, %v4931_v52  ;;  %v4999_v16 = vpop.eup %4475 }
  0x88   :  { %5818 = vst [vmem:[#allocation14_spill] sm:$0xff] %v4953_v62  ;;  %v4960_v1 = vadd.f32 1.0, %v4943_v59  ;;  %4485 = vrcp.f32 %v4943_v59  ;;  %v4965_v2 = vmul.f32 %v4953_v62, %v4905_v43  ;;  %5820 = vst [vmem:[#allocation16_spill] sm:$0xff] %v4968_v3  ;;  %v4977_v6 = vsel %vm99_vm4, 1.0, %v4871_v11 }
  0x89   :  { %4487 = vlog2.f32 %v4921_v48  ;;  %5821 = vst [vmem:[#allocation17_spill] sm:$0xff] %v4977_v6  ;;  %v4991_v13 = vadd.f32 1.0, %v4950_v61  ;;  %v2333_v11 = vadd.f32 1.0, %v4968_v3  ;;  %v1565_v14 = vsel %vm178_vm0, %v4977_v6, 0.0 }
  0x8a   :  { %5819 = vst [vmem:[#allocation15_spill] sm:$0xff] %v4965_v2  ;;  %4489 = vrcp.f32 %v4960_v1  ;;  %186 = vadd.xlane.f32.xlu0 %v185_v63  ;;  %1566 = vadd.xlane.f32.xlu1 %v1565_v14  ;;  %v2331_v24 = vadd.f32 1.0, %v4977_v6  ;;  %v1571_v37 = vsel %vm178_vm0, %v4968_v3, 0.0  ;;  %v5036_v44 = vmul.f32 %v4996_v15, %v4996_v15 }
  0x8b   :  { %4491 = vlog2.f32 %v2330_v54  ;;  %v5012_v23 = vadd.f32 1.0, %v2333_v11  ;;  %v2522_v39 = vadd.f32 1.0, %v4991_v13 }
  0x8c   :  { %4493 = vrcp.f32 %v4921_v48  ;;  %v5026_v35 = vadd.f32 1.0, %v2331_v24  ;;  %v676_v21 = vmul.f32 0.003968254, %v5036_v44 }
  0x8d   :  { %4495 = vrcp.f32 %v2330_v54  ;;  %v5024_v34 = vadd.f32 1.0, %v5012_v23  ;;  %v707_v54 = vmul.f32 %v691_v31, %v4986_v10  ;;  %v2586_v49 = vadd.f32 1.0, %v2522_v39 }
  0x8e   :  { %v5005_v19 = vpop.eup %4477  ;;  %4497 = vrcp.f32 %v4950_v61  ;;  %189 = vadd.xlane.f32.xlu0 %v188_v9  ;;  %1569 = vadd.xlane.f32.xlu1 %v1568_v17  ;;  %v5041_v63 = vadd.f32 1.0, %v5026_v35  ;;  %v452_v9 = vadd.f32 %v4933_v53, %v388_v32 }
  0x8f   :  { %v4480_v22 = vpop.eup %4479  ;;  %4499 = vrcp.f32 %v4991_v13  ;;  %v5057_v58 = vadd.f32 1.0, %v2586_v49 }
  0x90   :  { %v5015_v26 = vpop.eup %4481  ;;  %4501 = vlog2.f32 %v4968_v3  ;;  %v5095_v41 = vadd.f32 1.0, %v5041_v63 }
  0x91   :  { %v4484_v27 = vpop.eup %4483  ;;  %4503 = vlog2.f32 %v2333_v11 }
  0x92   :  { %v4486_v30 = vpop.eup %4485  ;;  %4505 = vrcp.f32 %v4968_v3  ;;  %1572 = vadd.xlane.f32.xlu1 %v1571_v37  ;;  %v3132_v55 = vadd.f32 %v4484_v27, %v4480_v22  ;;  %v723_v27 = vsub.f32 0.083333336, %v707_v54 }
  0x93   :  { %v5021_v33 = vpop.eup %4487  ;;  %4507 = vrcp.f32 %v2333_v11 }
  0x94   :  { %v4490_v38 = vpop.eup %4489  ;;  %4509 = vrcp.f32 %v5012_v23  ;;  %v3180_v17 = vadd.f32 %v4486_v30, %v3132_v55  ;;  %v516_v30 = vadd.f32 %v4957_v0, %v452_v9  ;;  %v659_v0 = vmul.f32 -0.5, %v4948_v60 }
  0x95   :  { %v4492_v40 = vpop.eup %4491  ;;  %4511 = vrcp.f32 %v5024_v34  ;;  %v772_v9 = vmul.f32 0.6931472, %v4988_v12  ;;  %v5083_v60 = vsel %vm98_vm2, 1.0, %v4824_v45 }
  0x96   :  { %v4494_v51 = vpop.eup %4493  ;;  %4513 = vlog2.f32 %v4977_v6  ;;  %v5050_v31 = vadd.f32 %v4490_v38, %v3180_v17  ;;  %v5066_v38 = vadd.f32 %v4970_v4, %v515_v20 }
  0x97   :  { %v4496_v57 = vpop.eup %4495  ;;  %4515 = vlog2.f32 %v2331_v24 }
  0x98   :  { %v4498_v11 = vpop.eup %4497  ;;  %4517 = vrcp.f32 %v4977_v6  ;;  %v3130_v14 = vadd.f32 %v4496_v57, %v4494_v51  ;;  %5822 = vst [vmem:[#allocation18_spill] sm:$0xff] %v5066_v38  ;;  %v692_v51 = vsub.f32 0.008333334, %v676_v21 }
  0x99   :  { %v4500_v18 = vpop.eup %4499  ;;  %4519 = vrcp.f32 %v2331_v24  ;;  %v5060_v24 = vadd.f32 1.0, %v4960_v1 }
  0x9a   :  { %v5047_v22 = vpop.eup %4501  ;;  %4521 = vrcp.f32 %v5026_v35  ;;  %v3178_v28 = vadd.f32 %v4498_v11, %v3130_v14  ;;  %v5072_v11 = vadd.f32 %v4979_v8, %v516_v30  ;;  %v2347_v8 = vmul.f32 0.6931472, %v4492_v40 }
  0x9b   :  { %v5052_v53 = vpop.eup %4503  ;;  %4523 = vrcp.f32 %v5041_v63  ;;  %v708_v17 = vmul.f32 %v692_v51, %v5036_v44  ;;  %v2283_v40 = vmul.f32 0.6931472, %v5021_v33  ;;  %v5105_v30 = vmul.f32 0.6931472, %v4999_v16 }
  0x9c   :  { %v4506_v32 = vpop.eup %4505  ;;  %4525 = vlog2.f32 %v4950_v61  ;;  %v5062_v37 = vadd.f32 %v4500_v18, %v3178_v28  ;;  %v739_v61 = vmul.f32 %v723_v27, %v4986_v10  ;;  %v2588_v10 = vadd.f32 1.0, %v5060_v24 }
  0x9d   :  { %v4508_v42 = vpop.eup %4507  ;;  %4527 = vlog2.f32 %v4991_v13  ;;  %v5075_v13 = vmul.f32 -0.5, %v4996_v15  ;;  %v5091_v15 = vadd.f32 1.0, %v5024_v34  ;;  %v5101_v28 = vmul.f32 %v5083_v60, %v4905_v43 }
  0x9e   :  { %v4510_v54 = vpop.eup %4509  ;;  %4529 = vlog2.f32 %v2522_v39  ;;  %v3133_v55 = vadd.f32 %v4508_v42, %v4506_v32  ;;  %v755_v20 = vsub.f32 %v659_v0, %v739_v61  ;;  %v5109_v42 = vadd.f32 1.0, %v2588_v10 }
  0x9f   :  { %v4512_v57 = vpop.eup %4511  ;;  %4531 = vlog2.f32 %v2586_v49  ;;  %5823 = vst [vmem:[#allocation19_spill] sm:$0xff] %v5101_v28  ;;  %v2378_v0 = vadd.f32 %v2347_v8, %v2283_v40  ;;  %v2351_v61 = vmul.f32 0.6931472, %v5015_v26  ;;  %v5114_v33 = vadd.f32 1.0, %v5091_v15 }
  0xa0   :  { %v5077_v4 = vpop.eup %4513  ;;  %4533 = vrcp.f32 %v5057_v58  ;;  %v3181_v14 = vadd.f32 %v4510_v54, %v3133_v55  ;;  %v5117_v16 = vadd.f32 1.0, %v5095_v41  ;;  %v5119_v55 = vadd.f32 %v772_v9, %v755_v20 }
  0xa1   :  { %v5087_v12 = vpop.eup %4515  ;;  %4535 = vlog2.f32 %v5057_v58  ;;  %v5131_v9 = vadd.f32 -0.5, %v5109_v42 }
  0xa2   :  { %v4518_v18 = vpop.eup %4517  ;;  %4537 = vrcp.f32 %v2522_v39  ;;  %v5097_v21 = vadd.f32 %v4512_v57, %v3181_v14  ;;  %v2287_v39 = vmul.f32 0.6931472, %v5005_v19  ;;  %5824 = vst [vmem:[#allocation20_spill] sm:$0xff] %v5119_v55  ;;  %v724_v19 = vsub.f32 0.083333336, %v708_v17 }
  0xa3   :  { %v4520_v27 = vpop.eup %4519  ;;  %4539 = vrcp.f32 %v2586_v49  ;;  %v5125_v14 = vsel %vm99_vm4, 1.0, %v4824_v45  ;;  %v5137_v45 = vadd.f32 1.0, %v5114_v33 }
  0xa4   :  { %v4522_v32 = vpop.eup %4521  ;;  %4541 = vlog2.f32 %v4943_v59  ;;  %v3131_v51 = vadd.f32 %v4520_v27, %v4518_v18  ;;  %v2380_v40 = vadd.f32 %v2351_v61, %v2287_v39  ;;  %v2289_v39 = vmul.f32 0.6931472, %v5047_v22 }
  0xa5   :  { %v4524_v54 = vpop.eup %4523  ;;  %4543 = vlog2.f32 %v4960_v1  ;;  %v4386_v1 = vadd.f32 -0.5, %v5057_v58  ;;  %v5156_v61 = vadd.f32 -0.5, %v5137_v45 }
  0xa6   :  { %v4526_v49 = vpop.eup %4525  ;;  %v3179_v59 = vadd.f32 %v4522_v32, %v3131_v51  ;;  %4545 = vlog2.f32 %v5060_v24  ;;  %v5142_v32 = vadd.f32 1.0, %v5117_v16  ;;  %v2353_v51 = vmul.f32 0.6931472, %v5052_v53 }
  0xa7   :  { %v4528_v57 = vpop.eup %4527  ;;  %v2411_v26 = vmul.f32 0.6931472, %v4526_v49  ;;  %4547 = vrcp.f32 %v5109_v42 }
  0xa8   :  { %v4530_v8 = vpop.eup %4529  ;;  %v2475_v18 = vmul.f32 0.6931472, %v4528_v57  ;;  %v5133_v17 = vadd.f32 %v4524_v54, %v3179_v59  ;;  %4549 = vlog2.f32 %v5109_v42  ;;  %v5147_v54 = vmul.f32 %v724_v19, %v5036_v44 }
  0xa9   :  { %v4532_v20 = vpop.eup %4531  ;;  %v2442_v27 = vadd.f32 %v2411_v26, %v2378_v0  ;;  %4551 = vlog2.f32 %v2588_v10  ;;  %v2539_v26 = vmul.f32 0.6931472, %v4530_v8  ;;  %v2285_v8 = vmul.f32 0.6931472, %v5077_v4 }
  0xaa   :  { %v5139_v56 = vpop.eup %4533  ;;  %4553 = vrcp.f32 %v5060_v24  ;;  %v2349_v24 = vmul.f32 0.6931472, %v5087_v12  ;;  %v5179_v53 = vadd.f32 %v2353_v51, %v2289_v39 }
  0xab   :  { %v4536_v49 = vpop.eup %4535  ;;  %v5152_v0 = vmul.f32 %v5139_v56, %v5139_v56  ;;  %v2506_v57 = vadd.f32 %v2475_v18, %v2442_v27  ;;  %4555 = vrcp.f32 %v2588_v10  ;;  %v5167_v18 = vadd.f32 -0.5, %v5142_v32 }
  0xac   :  { %v4538_v59 = vpop.eup %4537  ;;  %v5160_v29 = vmul.f32 0.6931472, %v4536_v49  ;;  %4557 = vlog2.f32 %v5026_v35 }
  0xad   :  { %v4540_v44 = vpop.eup %4539  ;;  %v2714_v19 = vmul.f32 0.0005952381, %v5152_v0  ;;  %v3274_v22 = vadd.f32 %v4538_v59, %v5062_v37  ;;  %4559 = vlog2.f32 %v5041_v63  ;;  %v2570_v35 = vadd.f32 %v2539_v26, %v2506_v57 }
  0xae   :  { %v4542_v25 = vpop.eup %4541  ;;  %4561 = vlog2.f32 %v5095_v41  ;;  %v2603_v37 = vmul.f32 0.6931472, %v4532_v20  ;;  %v2874_v2 = vmul.f32 %v4386_v1, %v5160_v29  ;;  %v2379_v57 = vadd.f32 %v2349_v24, %v2285_v8 }
  0xaf   :  { %v4544_v10 = vpop.eup %4543  ;;  %v2730_v27 = vsub.f32 0.0007936508, %v2714_v19  ;;  %v2415_v49 = vmul.f32 0.6931472, %v4542_v25  ;;  %4563 = vlog2.f32 %v5117_v16  ;;  %v5174_v12 = vadd.f32 %v4540_v44, %v3274_v22 }
  0xb0   :  { %v4546_v63 = vpop.eup %4545  ;;  %4565 = vrcp.f32 %v5142_v32  ;;  %v2479_v62 = vmul.f32 0.6931472, %v4544_v10  ;;  %v3354_v22 = vmul.f32 0.003968254, %v5152_v0  ;;  %v5185_v1 = vadd.f32 %v2603_v37, %v2570_v35 }
  0xb1   :  { %v2746_v59 = vmul.f32 %v2730_v27, %v5152_v0  ;;  %v5181_v4 = vpop.eup %4547  ;;  %v2444_v19 = vadd.f32 %v2415_v49, %v2380_v40  ;;  %4567 = vlog2.f32 %v5142_v32  ;;  %v2890_v8 = vsub.f32 %v2874_v2, %v5057_v58 }
  0xb2   :  { %v181_v25 = vpop.xlane.xlu0 %180  ;;  %v4550_v20 = vpop.eup %4549  ;;  %v5189_v51 = vmul.f32 %v5181_v4, %v5181_v4 }
  0xb3   :  { %4569 = vrcp.f32 %v181_v25  ;;  %v883_v26 = vadd.f32 1.0, %v181_v25  ;;  %v2762_v44 = vadd.f32 -0.0027777778, %v2746_v59  ;;  %v4552_v27 = vpop.eup %4551  ;;  %v5191_v39 = vmul.f32 0.6931472, %v4550_v20 }
  0xb4   :  { %4571 = vrcp.f32 %v5095_v41  ;;  %v5194_v40 = vpop.eup %4553  ;;  %v2508_v37 = vadd.f32 %v2479_v62, %v2444_v19  ;;  %v2543_v59 = vmul.f32 0.6931472, %v4546_v63  ;;  %v2716_v25 = vmul.f32 0.0005952381, %v5189_v51 }
  0xb5   :  { %v947_v24 = vadd.f32 1.0, %v883_v26  ;;  %v2778_v10 = vmul.f32 %v2762_v44, %v5152_v0  ;;  %4573 = vrcp.f32 %v5117_v16  ;;  %v5199_v49 = vpop.eup %4555  ;;  %v2607_v44 = vmul.f32 0.6931472, %v4552_v27 }
  0xb6   :  { %4575 = vrcp.f32 %v883_v26  ;;  %v184_v35 = vpop.xlane.xlu0 %183  ;;  %v4558_v20 = vpop.eup %4557  ;;  %v2732_v2 = vsub.f32 0.0007936508, %v2716_v25  ;;  %v2876_v58 = vmul.f32 %v5131_v9, %v5191_v39  ;;  %v3370_v63 = vsub.f32 0.008333334, %v3354_v22 }
  0xb7   :  { %v1011_v50 = vadd.f32 1.0, %v947_v24  ;;  %v884_v41 = vadd.f32 1.0, %v184_v35  ;;  %v2794_v46 = vadd.f32 0.083333336, %v2778_v10  ;;  %4577 = vlog2.f32 %v5012_v23  ;;  %v4560_v3 = vpop.eup %4559 }
  0xb8   :  { %4579 = vrcp.f32 %v184_v35  ;;  %v4562_v16 = vpop.eup %4561  ;;  %v2572_v6 = vadd.f32 %v2543_v59, %v2508_v37  ;;  %v2748_v47 = vmul.f32 %v2732_v2, %v5189_v51  ;;  %v2413_v10 = vmul.f32 0.6931472, %v4558_v20 }
  0xb9   :  { %4581 = vrcp.f32 %v947_v24  ;;  %v1075_v26 = vadd.f32 1.0, %v1011_v50  ;;  %v948_v62 = vadd.f32 1.0, %v884_v41  ;;  %v4564_v19 = vpop.eup %4563  ;;  %v2810_v35 = vmul.f32 %v5139_v56, %v2794_v46 }
  0xba   :  { %4583 = vrcp.f32 %v884_v41  ;;  %v5206_v48 = vpop.eup %4565  ;;  %v2906_v9 = vadd.f32 0.9189385, %v2890_v8  ;;  %v2764_v24 = vadd.f32 -0.0027777778, %v2748_v47  ;;  %v2892_v52 = vsub.f32 %v2876_v58, %v5109_v42 }
  0xbb   :  { %4585 = vrcp.f32 %v1011_v50  ;;  %v1139_v23 = vadd.f32 1.0, %v1075_v26  ;;  %v1012_v27 = vadd.f32 1.0, %v948_v62  ;;  %v4568_v25 = vpop.eup %4567  ;;  %v2443_v59 = vadd.f32 %v2413_v10, %v2379_v57 }
  0xbc   :  { %4587 = vrcp.f32 %v948_v62  ;;  %v2477_v41 = vmul.f32 0.6931472, %v4560_v3  ;;  %v2780_v2 = vmul.f32 %v2764_v24, %v5189_v51  ;;  %v5216_v46 = vmul.f32 %v3370_v63, %v5152_v0 }
  0xbd   :  { %v4570_v22 = vpop.eup %4569  ;;  %v5210_v36 = vadd.f32 1.0, %v1139_v23  ;;  %v1076_v37 = vadd.f32 1.0, %v1012_v27  ;;  %4589 = vrcp.f32 %v1075_v26  ;;  %v2922_v42 = vadd.f32 %v2906_v9, %v2810_v35 }
  0xbe   :  { %v5212_v20 = vpop.eup %4571  ;;  %v4010_v50 = vmul.f32 -4.0, %v4570_v22  ;;  %v2636_v8 = vadd.f32 %v2607_v44, %v2572_v6  ;;  %v2796_v57 = vadd.f32 0.083333336, %v2780_v2  ;;  %v2908_v10 = vadd.f32 0.9189385, %v2892_v52 }
  0xbf   :  { %v5218_v62 = vpop.eup %4573  ;;  %4591 = vrcp.f32 %v5210_v36  ;;  %v1140_v47 = vadd.f32 1.0, %v1076_v37  ;;  %v2507_v43 = vadd.f32 %v2477_v41, %v2443_v59  ;;  %v2541_v63 = vmul.f32 0.6931472, %v4562_v16 }
  0xc0   :  { %v4576_v58 = vpop.eup %4575  ;;  %4593 = vrcp.f32 %v1139_v23  ;;  %v4026_v3 = vmul.f32 %v5083_v60, %v4010_v50  ;;  %v2812_v55 = vmul.f32 %v5181_v4, %v2796_v57  ;;  %v5228_v6 = vmul.f32 %v5206_v48, %v5206_v48 }
  0xc1   :  { %v5222_v26 = vpop.eup %4577  ;;  %4595 = vrcp.f32 %v1012_v27  ;;  %v1204_v24 = vadd.f32 1.0, %v1140_v47  ;;  %v5230_v44 = vmul.f32 0.6931472, %v4568_v25  ;;  %v931_v23 = vadd.f32 %v4576_v58, %v4570_v22 }
  0xc2   :  { %v4580_v28 = vpop.eup %4579  ;;  %v4042_v38 = vmul.f32 %v4026_v3, %v4861_v5  ;;  %v2938_v52 = vsub.f32 %v2922_v42, %v5185_v1  ;;  %v2924_v9 = vadd.f32 %v2908_v10, %v2812_v55  ;;  %v2715_v5 = vmul.f32 0.0005952381, %v5228_v6 }
  0xc3   :  { %v4582_v60 = vpop.eup %4581  ;;  %4597 = vrcp.f32 %v1204_v24  ;;  %v4011_v27 = vmul.f32 -4.0, %v4580_v28  ;;  %v2571_v50 = vadd.f32 %v2541_v63, %v2507_v43  ;;  %v2605_v25 = vmul.f32 0.6931472, %v4564_v19 }
  0xc4   :  { %v4584_v35 = vpop.eup %4583  ;;  %4599 = vrcp.f32 %v1076_v37  ;;  %v4058_v16 = vsel %vm178_vm0, %v4042_v38, 0.0  ;;  %v2875_v22 = vmul.f32 %v5167_v18, %v5230_v44  ;;  %v2731_v1 = vsub.f32 0.0007936508, %v2715_v5 }
  0xc5   :  { %v4586_v59 = vpop.eup %4585  ;;  %4059 = vadd.xlane.f32.xlu1 %v4058_v16  ;;  %v4027_v41 = vmul.f32 %v5125_v14, %v4011_v27  ;;  %v932_v58 = vadd.f32 %v4584_v35, %v4580_v28  ;;  %4601 = vrcp.f32 %v1140_v47  ;;  %v3402_v37 = vsub.f32 0.083333336, %v5216_v46 }
  0xc6   :  { %v4588_v2 = vpop.eup %4587  ;;  %v2940_v55 = vsub.f32 %v2924_v9, %v2636_v8  ;;  %4603 = vlog2.f32 %v5024_v34  ;;  %v995_v42 = vadd.f32 %v4582_v60, %v931_v23  ;;  %v2954_v57 = vsel %vm178_vm0, %v2938_v52, 0.0 }
  0xc7   :  { %v4043_v38 = vmul.f32 %v4027_v41, %v4867_v7  ;;  %v4590_v3 = vpop.eup %4589  ;;  %v2747_v43 = vmul.f32 %v2731_v1, %v5228_v6  ;;  %4605 = vrcp.f32 %v5137_v45  ;;  %v3338_v18 = vmul.f32 -0.5, %v5139_v56 }
  0xc8   :  { %v5246_v46 = vadd.f32 %v2605_v25, %v2571_v50  ;;  %v2891_v7 = vsub.f32 %v2875_v22, %v5142_v32  ;;  %4607 = vlog2.f32 %v5137_v45  ;;  %v996_v10 = vadd.f32 %v4588_v2, %v932_v58 }
  0xc9   :  { %v4592_v28 = vpop.eup %4591  ;;  %2955 = vadd.xlane.f32.xlu1 %v2954_v57  ;;  %v4061_v19 = vsel %vm178_vm0, %v4043_v38, 0.0  ;;  %v2763_v47 = vadd.f32 -0.0027777778, %v2747_v43  ;;  %4609 = vlog2.f32 %v5091_v15  ;;  %v2960_v56 = vsel %vm178_vm0, %v2940_v55, 0.0 }
  0xca   :  { %v4594_v34 = vpop.eup %4593  ;;  %4062 = vadd.xlane.f32.xlu0 %v4061_v19  ;;  %v1251_v8 = vmul.f32 %v4592_v28, %v4592_v28  ;;  %4611 = vlog2.f32 %v5114_v33  ;;  %v1059_v60 = vadd.f32 %v4586_v59, %v995_v42  ;;  %v3418_v23 = vmul.f32 %v3402_v37, %v5152_v0 }
  0xcb   :  { %v4596_v63 = vpop.eup %4595  ;;  %v2779_v52 = vmul.f32 %v2763_v47, %v5228_v6  ;;  %4613 = vlog2.f32 %v5210_v36  ;;  %v3276_v27 = vadd.f32 %v5194_v40, %v5050_v31  ;;  %v2907_v16 = vadd.f32 0.9189385, %v2891_v7 }
  0xcc   :  { %v1283_v32 = vmul.f32 0.003968254, %v1251_v8  ;;  %v2417_v9 = vmul.f32 0.6931472, %v5222_v26  ;;  %4615 = vlog2.f32 %v1204_v24  ;;  %v3434_v5 = vsub.f32 %v3338_v18, %v3418_v23 }
  0xcd   :  { %v4598_v35 = vpop.eup %4597  ;;  %2961 = vadd.xlane.f32.xlu1 %v2960_v56  ;;  %v2795_v50 = vadd.f32 0.083333336, %v2779_v52  ;;  %v1060_v25 = vadd.f32 %v4596_v63, %v996_v10  ;;  %4617 = vrcp.f32 %v5091_v15  ;;  %v5264_v36 = vadd.f32 %v5199_v49, %v3276_v27 }
  0xce   :  { %v4600_v41 = vpop.eup %4599  ;;  %v1299_v59 = vsub.f32 0.008333334, %v1283_v32  ;;  %v1252_v0 = vmul.f32 %v4598_v35, %v4598_v35  ;;  %v5261_v22 = vadd.f32 %v3434_v5, %v5160_v29  ;;  %v3356_v31 = vmul.f32 0.003968254, %v5189_v51 }
  0xcf   :  { %v4602_v40 = vpop.eup %4601  ;;  %v2811_v26 = vmul.f32 %v5206_v48, %v2795_v50  ;;  %v1123_v24 = vadd.f32 %v4590_v3, %v1059_v60  ;;  %4619 = vrcp.f32 %v5114_v33  ;;  %v3275_v29 = vadd.f32 %v5212_v20, %v5133_v17 }
  0xd0   :  { %v1315_v2 = vmul.f32 %v1299_v59, %v1251_v8  ;;  %v1284_v58 = vmul.f32 0.003968254, %v1252_v0  ;;  %v4604_v1 = vpop.eup %4603  ;;  %v3372_v37 = vsub.f32 0.008333334, %v3356_v31  ;;  %v2445_v55 = vadd.f32 %v2417_v9, %v5179_v53 }
  0xd1   :  { %v5273_v49 = vpop.eup %4605  ;;  %v2923_v38 = vadd.f32 %v2907_v16, %v2811_v26  ;;  %v1267_v42 = vmul.f32 -0.5, %v4592_v28  ;;  %v1124_v33 = vadd.f32 %v4600_v41, %v1060_v25  ;;  %v1187_v20 = vadd.f32 %v4594_v34, %v1123_v24 }
  0xd2   :  { %v1331_v57 = vsub.f32 0.083333336, %v1315_v2  ;;  %v4608_v3 = vpop.eup %4607  ;;  %v5278_v43 = vmul.f32 %v5273_v49, %v5273_v49  ;;  %v1300_v18 = vsub.f32 0.008333334, %v1284_v58  ;;  %v3388_v19 = vmul.f32 %v3372_v37, %v5189_v51 }
  0xd3   :  { %v4610_v7 = vpop.eup %4609  ;;  %v2939_v47 = vsub.f32 %v2923_v38, %v5246_v46  ;;  %v5282_v17 = vmul.f32 0.6931472, %v4608_v3  ;;  %v1268_v28 = vmul.f32 -0.5, %v4598_v35  ;;  %v2481_v32 = vmul.f32 0.6931472, %v4604_v1 }
  0xd4   :  { %v1347_v10 = vmul.f32 %v1331_v57, %v1251_v8  ;;  %v4612_v63 = vpop.eup %4611  ;;  %v2717_v53 = vmul.f32 0.0005952381, %v5278_v43  ;;  %v1316_v56 = vmul.f32 %v1300_v18, %v1252_v0  ;;  %v3404_v60 = vsub.f32 0.083333336, %v3388_v19  ;;  %v5826_v57 = vld [vmem:[#allocation20_spill] sm:$0xff] }
  0xd5   :  { %v4614_v23 = vpop.eup %4613  ;;  %v2957_v52 = vsel %vm178_vm0, %v2939_v47, 0.0  ;;  %v3340_v16 = vmul.f32 -0.5, %v5181_v4  ;;  %v2877_v8 = vmul.f32 %v5156_v61, %v5282_v17  ;;  %v5825_v35 = vsub.f32 %v5075_v13, %v5147_v54 }
  0xd6   :  { %v1363_v27 = vsub.f32 %v1267_v42, %v1347_v10  ;;  %v4616_v9 = vpop.eup %4615  ;;  %2958 = vadd.xlane.f32.xlu0 %v2957_v52  ;;  %v2733_v46 = vsub.f32 0.0007936508, %v2717_v53  ;;  %v1380_v5 = vmul.f32 0.6931472, %v4614_v23  ;;  %v1332_v41 = vsub.f32 0.083333336, %v1316_v56 }
  0xd7   :  { %v3420_v34 = vmul.f32 %v3404_v60, %v5189_v51  ;;  %v804_v50 = vadd.f32 %v5105_v30, %v5825_v35  ;;  %v1382_v59 = vmul.f32 0.6931472, %v4616_v9  ;;  %v5295_v25 = vadd.f32 %v5218_v62, %v3275_v29  ;;  %v4618_v4 = vpop.eup %4617  ;;  %v5831_v9 = vld [vmem:[#allocation8_spill] sm:$0xff] }
  0xd8   :  { %v2749_v31 = vmul.f32 %v2733_v46, %v5278_v43  ;;  %v1411_v26 = vadd.f32 %v1380_v5, %v1363_v27  ;;  %v1348_v24 = vmul.f32 %v1332_v41, %v1252_v0  ;;  %v2509_v58 = vadd.f32 %v2481_v32, %v2445_v55 }
  0xd9   :  { %v3436_v2 = vsub.f32 %v3340_v16, %v3420_v34  ;;  %v2545_v51 = vmul.f32 0.6931472, %v4610_v7  ;;  %v1188_v1 = vadd.f32 %v4602_v40, %v1124_v33  ;;  %v3355_v61 = vmul.f32 0.003968254, %v5228_v6  ;;  %v4620_v37 = vpop.eup %4619  ;;  %v5827_v40 = vld [vmem:[#allocation18_spill] sm:$0xff] }
  0xda   :  { %v2765_v38 = vadd.f32 -0.0027777778, %v2749_v31  ;;  %v1427_v13 = vsub.f32 %v1411_v26, %v1187_v20  ;;  %v1364_v54 = vsub.f32 %v1268_v28, %v1348_v24  ;;  %v2893_v62 = vsub.f32 %v2877_v8, %v5137_v45  ;;  %v5842_v31 = vld [vmem:[#allocation17_spill] sm:$0xff] }
  0xdb   :  { %v5300_v30 = vadd.f32 %v3436_v2, %v5191_v39  ;;  %v820_v29 = vsub.f32 %v804_v50, %v5072_v11  ;;  %v3371_v42 = vsub.f32 0.008333334, %v3355_v61  ;;  %v3277_v0 = vadd.f32 %v4618_v4, %v5097_v21  ;;  %v5830_v21 = vld [vmem:[#allocation19_spill] sm:$0xff] }
  0xdc   :  { %v2781_v55 = vmul.f32 %v2765_v38, %v5278_v43  ;;  %v5828_v3 = vsub.f32 %v5826_v57, %v5827_v40  ;;  %v1412_v18 = vadd.f32 %v1382_v59, %v1364_v54  ;;  %v2609_v7 = vmul.f32 0.6931472, %v4612_v63  ;;  %v5833_v2 = vld [vmem:[#allocation7_spill] sm:$0xff] }
  0xdd   :  { %v3387_v39 = vmul.f32 %v3371_v42, %v5228_v6  ;;  %v5312_v47 = vadd.f32 %v4620_v37, %v3277_v0  ;;  %v3357_v11 = vmul.f32 0.003968254, %v5278_v43  ;;  %v2573_v45 = vadd.f32 %v2545_v51, %v2509_v58 }
  0xde   :  { %v1466_v33 = vsub.f32 %v1427_v13, %v5828_v3  ;;  %v2797_v20 = vadd.f32 0.083333336, %v2781_v55  ;;  %v1428_v53 = vsub.f32 %v1412_v18, %v1188_v1  ;;  %v2909_v23 = vadd.f32 0.9189385, %v2893_v62 }
  0xdf   :  { %5829 = vst [vmem:[#allocation20_spill] sm:$0xff] %v5312_v47  ;;  %v3403_v28 = vsub.f32 0.083333336, %v3387_v39  ;;  %v3373_v56 = vsub.f32 0.008333334, %v3357_v11  ;;  %v3339_v63 = vmul.f32 -0.5, %v5206_v48  ;;  %v1451_v46 = vmul.f32 %v5125_v14, %v5831_v9 }
  0xe0   :  { %v1482_v10 = vmul.f32 %v1466_v33, %v5830_v21  ;;  %v2813_v60 = vmul.f32 %v5273_v49, %v2797_v20  ;;  %v1467_v32 = vsub.f32 %v1428_v53, %v820_v29  ;;  %v2637_v5 = vadd.f32 %v2609_v7, %v2573_v45 }
  0xe1   :  { %v3419_v27 = vmul.f32 %v3403_v28, %v5228_v6  ;;  %v3389_v16 = vmul.f32 %v3373_v56, %v5278_v43  ;;  %v3341_v4 = vmul.f32 -0.5, %v5273_v49  ;;  %v277_v49 = vadd.f32 1.0, %v5833_v2 }
  0xe2   :  { %v1498_v52 = vsel %vm178_vm0, %v1482_v10, 0.0  ;;  %v2925_v41 = vadd.f32 %v2909_v23, %v2813_v60  ;;  %v1483_v50 = vmul.f32 %v1467_v32, %v1451_v46  ;;  %4621 = vrcp.f32 %v5833_v2 }
  0xe3   :  { %1499 = vadd.xlane.f32.xlu1 %v1498_v52  ;;  %v3435_v34 = vsub.f32 %v3339_v63, %v3419_v27  ;;  %v3405_v8 = vsub.f32 0.083333336, %v3389_v16  ;;  %v341_v58 = vadd.f32 1.0, %v277_v49  ;;  %4623 = vrcp.f32 %v277_v49 }
  0xe4   :  { %v2941_v35 = vsub.f32 %v2925_v41, %v2637_v5  ;;  %v1501_v26 = vsel %vm178_vm0, %v1483_v50, 0.0 }
  0xe5   :  { %v5324_v59 = vadd.f32 %v3435_v34, %v5230_v44  ;;  %v3421_v48 = vmul.f32 %v3405_v8, %v5278_v43  ;;  %v5834_v43 = vld [vmem:[#allocation13_spill] sm:$0xff]  ;;  %v405_v1 = vadd.f32 1.0, %v341_v58  ;;  %4625 = vrcp.f32 %v341_v58 }
  0xe6   :  { %v2963_v6 = vsel %vm178_vm0, %v2941_v35, 0.0  ;;  %v278_v51 = vadd.f32 1.0, %v5834_v43  ;;  %4627 = vrcp.f32 %v5834_v43 }
  0xe7   :  { %2964 = vadd.xlane.f32.xlu0 %v2963_v6  ;;  %v3437_v14 = vsub.f32 %v3341_v4, %v3421_v48  ;;  %v469_v37 = vadd.f32 1.0, %v405_v1 }
  0xe8   :  { %v342_v61 = vadd.f32 1.0, %v278_v51 }
  0xe9   :  { %v5333_v24 = vadd.f32 %v3437_v14, %v5282_v17  ;;  %v533_v13 = vadd.f32 1.0, %v469_v37 }
  0xea   :  { %v406_v38 = vadd.f32 1.0, %v342_v61 }
  0xeb   :  { %5832 = vst [vmem:[#allocation18_spill] sm:$0xff] %v5333_v24  ;;  %1502 = vadd.xlane.f32.xlu0 %v1501_v26  ;;  %v597_v62 = vadd.f32 1.0, %v533_v13 }
  0xec   :  { %v470_v54 = vadd.f32 1.0, %v406_v38  ;;  %v5341_v42 = vpop.eup %4621 }
  0xed   :  { %4629 = vrcp.f32 %v597_v62  ;;  %v4624_v0 = vpop.eup %4623 }
  0xee   :  { %v534_v17 = vadd.f32 1.0, %v470_v54  ;;  %4631 = vrcp.f32 %v278_v51 }
  0xef   :  { %4633 = vrcp.f32 %v342_v61  ;;  %v5343_v55 = vpop.eup %4625  ;;  %v325_v61 = vadd.f32 %v4624_v0, %v5341_v42 }
  0xf0   :  { %4635 = vrcp.f32 %v405_v1  ;;  %v598_v29 = vadd.f32 1.0, %v534_v17  ;;  %v5345_v57 = vpop.eup %4627 }
  0xf1   :  { %4637 = vrcp.f32 %v469_v37 }
  0xf2   :  { %4639 = vrcp.f32 %v533_v13 }
  0xf3   :  { %4641 = vlog2.f32 %v597_v62 }
  0xf4   :  { %4643 = vrcp.f32 %v598_v29 }
  0xf5   :  { %4645 = vrcp.f32 %v406_v38 }
  0xf6   :  { %4647 = vrcp.f32 %v470_v54 }
  0xf7   :  { %v5347_v40 = vpop.eup %4629  ;;  %4649 = vrcp.f32 %v534_v17 }
  0xf8   :  { %v5349_v3 = vpop.eup %4631  ;;  %4651 = vlog2.f32 %v598_v29  ;;  %v5357_v11 = vmul.f32 %v5347_v40, %v5347_v40 }
  0xf9   :  { %v5351_v18 = vpop.eup %4633 }
  0xfa   :  { %v5353_v39 = vpop.eup %4635  ;;  %v677_v52 = vmul.f32 0.003968254, %v5357_v11 }
  0xfb   :  { %v5359_v45 = vpop.eup %4637 }
  0xfc   :  { %v5361_v21 = vpop.eup %4639  ;;  %v693_v35 = vsub.f32 0.008333334, %v677_v52 }
  0xfd   :  { %v5363_v53 = vpop.eup %4641 }
  0xfe   :  { %v5367_v60 = vpop.eup %4643  ;;  %v709_v13 = vmul.f32 %v693_v35, %v5357_v11 }
  0xff   :  { %v5370_v32 = vpop.eup %4645  ;;  %v5381_v34 = vmul.f32 %v5367_v60, %v5367_v60 }
 0x100   :  { %v5373_v16 = vpop.eup %4647 }
 0x101   :  { %v5377_v46 = vpop.eup %4649  ;;  %v678_v58 = vmul.f32 0.003968254, %v5381_v34 }
 0x102   :  { %v5383_v8 = vpop.eup %4651 }
 0x113   :  { %v1564_v33 = vpop.xlane.xlu0 %1563 }
 0x114   :  { %4653 = vlog2.f32 %v1564_v33  ;;  %v1658_v7 = vadd.f32 1.0, %v1564_v33 }
 0x115   :  { %4655 = vrcp.f32 %v1564_v33 }
 0x116   :  { %4657 = vlog2.f32 %v1658_v7  ;;  %v1722_v20 = vadd.f32 1.0, %v1658_v7 }
 0x117   :  { %4659 = vrcp.f32 %v1658_v7  ;;  %v187_v10 = vpop.xlane.xlu0 %186  ;;  %v1567_v23 = vpop.xlane.xlu1 %1566 }
 0x118   :  { %4661 = vlog2.f32 %v1722_v20  ;;  %v5365_v28 = vadd.f32 1.0, %v1722_v20  ;;  %v885_v56 = vadd.f32 1.0, %v187_v10  ;;  %v1659_v63 = vadd.f32 1.0, %v1567_v23 }
 0x119   :  { %4663 = vrcp.f32 %v1722_v20  ;;  %v694_v20 = vsub.f32 0.008333334, %v678_v58 }
 0x11a   :  { %4665 = vrcp.f32 %v5365_v28  ;;  %v949_v27 = vadd.f32 1.0, %v885_v56  ;;  %v1723_v5 = vadd.f32 1.0, %v1659_v63 }
 0x11b   :  { %4667 = vlog2.f32 %v1567_v23  ;;  %v5375_v9 = vpop.xlane.xlu0 %189  ;;  %v1570_v49 = vpop.xlane.xlu1 %1569 }
 0x11c   :  { %4669 = vlog2.f32 %v1659_v63  ;;  %v1013_v41 = vadd.f32 1.0, %v949_v27  ;;  %v5385_v4 = vadd.f32 1.0, %v1723_v5  ;;  %v5388_v6 = vadd.f32 1.0, %v5375_v9 }
 0x11d   :  { %4671 = vrcp.f32 %v1567_v23  ;;  %v1660_v29 = vadd.f32 1.0, %v1570_v49 }
 0x11e   :  { %v4654_v50 = vpop.eup %4653  ;;  %4673 = vlog2.f32 %v1723_v5  ;;  %5835 = vst [vmem:[#allocation19_spill] sm:$0xff] %v5385_v4  ;;  %v1077_v48 = vadd.f32 1.0, %v1013_v41  ;;  %v5398_v38 = vadd.f32 1.0, %v5388_v6 }
 0x11f   :  { %v5390_v14 = vpop.eup %4655  ;;  %4675 = vrcp.f32 %v1659_v63  ;;  %v1611_v51 = vmul.f32 0.6931472, %v4654_v50  ;;  %v725_v63 = vsub.f32 0.083333336, %v709_v13  ;;  %v1724_v50 = vadd.f32 1.0, %v1660_v29 }
 0x120   :  { %v4658_v26 = vpop.eup %4657  ;;  %4677 = vrcp.f32 %v1723_v5  ;;  %v1141_v2 = vadd.f32 1.0, %v1077_v48  ;;  %v1014_v52 = vadd.f32 1.0, %v5398_v38 }
 0x121   :  { %v5393_v43 = vpop.eup %4659  ;;  %v1675_v1 = vmul.f32 0.6931472, %v4658_v26  ;;  %4679 = vrcp.f32 %v5385_v4  ;;  %v5428_v13 = vadd.f32 1.0, %v1724_v50 }
 0x122   :  { %v4662_v37 = vpop.eup %4661  ;;  %4681 = vrcp.f32 %v187_v10  ;;  %v5405_v7 = vadd.f32 1.0, %v1141_v2  ;;  %v389_v10 = vadd.f32 %v5343_v55, %v325_v61 }
 0x123   :  { %v5401_v54 = vpop.eup %4663  ;;  %v1706_v62 = vadd.f32 %v1675_v1, %v1611_v51  ;;  %v1739_v17 = vmul.f32 0.6931472, %v4662_v37  ;;  %4683 = vrcp.f32 %v885_v56  ;;  %v326_v56 = vadd.f32 %v5349_v3, %v5345_v57 }
 0x124   :  { %v5403_v33 = vpop.eup %4665  ;;  %4685 = vrcp.f32 %v949_v27  ;;  %v453_v51 = vadd.f32 %v5353_v39, %v389_v10  ;;  %v1078_v57 = vadd.f32 1.0, %v1014_v52  ;;  %v661_v3 = vmul.f32 -0.5, %v5347_v40  ;;  %v1573_v10 = vpop.xlane.xlu1 %1572 }
 0x125   :  { %v4668_v42 = vpop.eup %4667  ;;  %v5407_v0 = vadd.f32 %v1739_v17, %v1706_v62  ;;  %4687 = vrcp.f32 %v1013_v41  ;;  %v710_v41 = vmul.f32 %v694_v20, %v5381_v34  ;;  %v390_v62 = vadd.f32 %v5351_v18, %v326_v56 }
 0x126   :  { %v4670_v23 = vpop.eup %4669  ;;  %4689 = vrcp.f32 %v1077_v48  ;;  %v1613_v27 = vmul.f32 0.6931472, %v4668_v42  ;;  %v517_v42 = vadd.f32 %v5359_v45, %v453_v51  ;;  %v662_v56 = vmul.f32 -0.5, %v5367_v60 }
 0x127   :  { %v5413_v5 = vpop.eup %4671  ;;  %v1677_v35 = vmul.f32 0.6931472, %v4670_v23  ;;  %4691 = vrcp.f32 %v1141_v2  ;;  %v741_v2 = vmul.f32 %v725_v63, %v5357_v11  ;;  %v726_v39 = vsub.f32 0.083333336, %v710_v41 }
 0x128   :  { %v4674_v26 = vpop.eup %4673  ;;  %4693 = vrcp.f32 %v5405_v7  ;;  %v1142_v11 = vadd.f32 1.0, %v1078_v57  ;;  %v776_v63 = vmul.f32 0.6931472, %v5363_v53  ;;  %v454_v18 = vadd.f32 %v5370_v32, %v390_v62  ;;  %v5838_v32 = vld [vmem:[#allocation10_spill] sm:$0xff] }
 0x129   :  { %v5417_v55 = vpop.eup %4675  ;;  %v1707_v48 = vadd.f32 %v1677_v35, %v1613_v27  ;;  %v1741_v58 = vmul.f32 0.6931472, %v4674_v26  ;;  %4695 = vlog2.f32 %v1570_v49  ;;  %v757_v23 = vsub.f32 %v661_v3, %v741_v2 }
 0x12a   :  { %v5420_v1 = vpop.eup %4677  ;;  %4697 = vlog2.f32 %v1660_v29  ;;  %v742_v35 = vmul.f32 %v726_v39, %v5381_v34  ;;  %v1661_v53 = vadd.f32 1.0, %v1573_v10  ;;  %v5453_v26 = vadd.f32 %v5361_v21, %v517_v42 }
 0x12b   :  { %v5424_v61 = vpop.eup %4679  ;;  %v5426_v37 = vadd.f32 %v1741_v58, %v1707_v48  ;;  %4699 = vlog2.f32 %v1724_v50  ;;  %v5456_v41 = vadd.f32 -1.0, %v5838_v32  ;;  %v5464_v60 = vadd.f32 1.0, %v1142_v11 }
 0x12c   :  { %v5431_v17 = vpop.eup %4681  ;;  %4701 = vrcp.f32 %v1570_v49  ;;  %v5466_v34 = vadd.f32 %v776_v63, %v757_v23  ;;  %v518_v51 = vadd.f32 %v5373_v16, %v454_v18  ;;  %v5477_v2 = vadd.f32 1.0, %v5428_v13 }
 0x12d   :  { %5836 = vst [vmem:[#allocation8_spill] sm:$0xff] %v5426_v37  ;;  %v4684_v20 = vpop.eup %4683  ;;  %4703 = vrcp.f32 %v1660_v29  ;;  %v5837_v29 = vld [vmem:[#allocation11_spill] sm:$0xff]  ;;  %v778_v62 = vmul.f32 0.6931472, %v5383_v8  ;;  %v1725_v63 = vadd.f32 1.0, %v1661_v53 }
 0x12e   :  { %v5434_v40 = vpop.eup %4685  ;;  %4705 = vrcp.f32 %v1724_v50  ;;  %v5445_v45 = vadd.f32 -1.0, %v5837_v29 }
 0x12f   :  { %v5437_v27 = vpop.eup %4687  ;;  %4707 = vrcp.f32 %v5428_v13 }
 0x130   :  { %v5441_v49 = vpop.eup %4689  ;;  %4709 = vrcp.f32 %v5375_v9  ;;  %v5461_v9 = vadd.f32 1.0, %v5365_v28 }
 0x131   :  { %v5449_v50 = vpop.eup %4691  ;;  %4711 = vrcp.f32 %v5388_v6  ;;  %v5469_v6 = vadd.f32 1.0, %v5385_v4 }
 0x132   :  { %v5458_v48 = vpop.eup %4693  ;;  %4713 = vrcp.f32 %v5398_v38  ;;  %v758_v38 = vsub.f32 %v662_v56, %v742_v35  ;;  %v5481_v29 = vadd.f32 1.0, %v5461_v9  ;;  %v933_v35 = vadd.f32 %v4684_v20, %v5431_v17 }
 0x133   :  { %v4696_v58 = vpop.eup %4695  ;;  %4715 = vrcp.f32 %v1014_v52  ;;  %v5473_v21 = vmul.f32 %v5458_v48, %v5458_v48  ;;  %v5488_v8 = vadd.f32 1.0, %v5469_v6  ;;  %v3563_v20 = vadd.f32 %v5417_v55, %v5413_v5  ;;  %v5844_v55 = vld [vmem:[#allocation16_spill] sm:$0xff] }
 0x134   :  { %v4698_v3 = vpop.eup %4697  ;;  %4717 = vrcp.f32 %v1078_v57  ;;  %v1615_v42 = vmul.f32 0.6931472, %v4696_v58  ;;  %v3562_v57 = vadd.f32 %v5393_v43, %v5390_v14  ;;  %v5494_v58 = vadd.f32 1.0, %v5477_v2 }
 0x135   :  { %v4700_v39 = vpop.eup %4699  ;;  %v1679_v23 = vmul.f32 0.6931472, %v4698_v3  ;;  %4719 = vrcp.f32 %v1142_v11  ;;  %v1285_v16 = vmul.f32 0.003968254, %v5473_v21  ;;  %v5497_v3 = vadd.f32 %v5377_v46, %v518_v51 }
 0x136   :  { %v4702_v52 = vpop.eup %4701  ;;  %v1743_v32 = vmul.f32 0.6931472, %v4700_v39  ;;  %4721 = vrcp.f32 %v5464_v60  ;;  %v5503_v14 = vadd.f32 1.0, %v1725_v63  ;;  %v5505_v43 = vadd.f32 %v778_v62, %v758_v38 }
 0x137   :  { %v4704_v18 = vpop.eup %4703  ;;  %v1708_v56 = vadd.f32 %v1679_v23, %v1615_v42  ;;  %4723 = vlog2.f32 %v1573_v10  ;;  %v5512_v23 = vadd.f32 1.0, %v5481_v29  ;;  %v1301_v46 = vsub.f32 0.008333334, %v1285_v16 }
 0x138   :  { %v5490_v11 = vpop.eup %4705  ;;  %4725 = vlog2.f32 %v1661_v53  ;;  %5840 = vst [vmem:[#allocation13_spill] sm:$0xff] %v5503_v14  ;;  %v5519_v38 = vadd.f32 -1.0, %v5842_v31  ;;  %v997_v19 = vadd.f32 %v5434_v40, %v933_v35  ;;  %v5523_v5 = vadd.f32 1.0, %v5494_v58 }
 0x139   :  { %v5499_v39 = vpop.eup %4707  ;;  %v5501_v44 = vadd.f32 %v1743_v32, %v1708_v56  ;;  %4727 = vlog2.f32 %v1725_v63  ;;  %v3610_v32 = vadd.f32 %v5401_v54, %v3562_v57  ;;  %v5516_v56 = vadd.f32 1.0, %v5488_v8 }
 0x13a   :  { %v5507_v42 = vpop.eup %4709  ;;  %4729 = vrcp.f32 %v1573_v10  ;;  %5843 = vst [vmem:[#allocation10_spill] sm:$0xff] %v5519_v38  ;;  %v5526_v10 = vadd.f32 -1.0, %v5844_v55  ;;  %v5530_v54 = vadd.f32 1.0, %v5503_v14  ;;  %v1317_v40 = vmul.f32 %v1301_v46, %v5473_v21 }
 0x13b   :  { %5839 = vst [vmem:[#allocation7_spill] sm:$0xff] %v5501_v44  ;;  %v4712_v51 = vpop.eup %4711  ;;  %4731 = vrcp.f32 %v1661_v53  ;;  %5841 = vst [vmem:[#allocation11_spill] sm:$0xff] %v5516_v56  ;;  %v3611_v57 = vadd.f32 %v5420_v1, %v3563_v20  ;;  %v5545_v15 = vadd.f32 -0.5, %v5512_v23  ;;  %v5548_v31 = vadd.f32 -0.5, %v5516_v56 }
 0x13c   :  { %v4714_v62 = vpop.eup %4713  ;;  %4733 = vrcp.f32 %v1725_v63  ;;  %5845 = vst [vmem:[#allocation17_spill] sm:$0xff] %v5526_v10  ;;  %v934_v53 = vadd.f32 %v4712_v51, %v5507_v42  ;;  %v3658_v51 = vadd.f32 %v5403_v33, %v3610_v32  ;;  %v3564_v10 = vadd.f32 %v4704_v18, %v4702_v52 }
 0x13d   :  { %v4716_v16 = vpop.eup %4715  ;;  %4735 = vrcp.f32 %v5503_v14  ;;  %5846 = vst [vmem:[#allocation16_spill] sm:$0xff] %v5548_v31  ;;  %v1061_v1 = vadd.f32 %v5437_v27, %v997_v19  ;;  %v5553_v20 = vadd.f32 -0.5, %v5523_v5  ;;  %v5556_v35 = vadd.f32 1.0, %v5530_v54 }
 0x13e   :  { %v4718_v63 = vpop.eup %4717  ;;  %4737 = vrcp.f32 %v5512_v23  ;;  %v998_v33 = vadd.f32 %v4714_v62, %v934_v53  ;;  %v1333_v31 = vsub.f32 0.083333336, %v1317_v40  ;;  %v5563_v52 = vadd.f32 %v5424_v61, %v3611_v57 }
 0x13f   :  { %v5540_v55 = vpop.eup %4719  ;;  %4739 = vlog2.f32 %v5512_v23  ;;  %v4012_v19 = vmul.f32 -4.0, %v5431_v17  ;;  %v1125_v53 = vadd.f32 %v5441_v49, %v1061_v1  ;;  %v5574_v4 = vadd.f32 1.0, %v5556_v35 }
 0x140   :  { %v4722_v37 = vpop.eup %4721  ;;  %4741 = vrcp.f32 %v5461_v9  ;;  %v1062_v17 = vadd.f32 %v4716_v16, %v998_v33  ;;  %v5590_v16 = vmul.f32 -4.0, %v5507_v42 }
 0x141   :  { %v4724_v46 = vpop.eup %4723  ;;  %4743 = vrcp.f32 %v5481_v29  ;;  %v5559_v32 = vmul.f32 %v4722_v37, %v4722_v37 }
 0x142   :  { %v4726_v14 = vpop.eup %4725  ;;  %4745 = vlog2.f32 %v5405_v7  ;;  %v1617_v18 = vmul.f32 0.6931472, %v4724_v46  ;;  %v3612_v7 = vadd.f32 %v5490_v11, %v3564_v10  ;;  %v1349_v11 = vmul.f32 %v1333_v31, %v5473_v21 }
 0x143   :  { %v4728_v27 = vpop.eup %4727  ;;  %v1681_v47 = vmul.f32 0.6931472, %v4726_v14  ;;  %4747 = vrcp.f32 %v5523_v5  ;;  %v1286_v24 = vmul.f32 0.003968254, %v5559_v32  ;;  %v1269_v10 = vmul.f32 -0.5, %v5458_v48 }
 0x144   :  { %v4730_v44 = vpop.eup %4729  ;;  %v1745_v62 = vmul.f32 0.6931472, %v4728_v27  ;;  %4749 = vlog2.f32 %v5523_v5  ;;  %v5847_v27 = vld [vmem:[#allocation9_spill] sm:$0xff]  ;;  %v3660_v21 = vadd.f32 %v5499_v39, %v3612_v7  ;;  %v1126_v31 = vadd.f32 %v4718_v63, %v1062_v17 }
 0x145   :  { %v4732_v40 = vpop.eup %4731  ;;  %v1709_v61 = vadd.f32 %v1681_v47, %v1617_v18  ;;  %4751 = vrcp.f32 %v5477_v2  ;;  %v1302_v57 = vsub.f32 0.008333334, %v1286_v24  ;;  %v5577_v38 = vmul.f32 %v5847_v27, %v4012_v19 }
 0x146   :  { %v4734_v46 = vpop.eup %4733  ;;  %v3565_v14 = vadd.f32 %v4732_v40, %v4730_v44  ;;  %4753 = vrcp.f32 %v5494_v58  ;;  %v1189_v44 = vadd.f32 %v5449_v50, %v1125_v53  ;;  %v5604_v39 = vmul.f32 -0.5, %v4722_v37 }
 0x147   :  { %v4736_v49 = vpop.eup %4735  ;;  %v5579_v1 = vadd.f32 %v1745_v62, %v1709_v61  ;;  %4755 = vrcp.f32 %v5516_v56  ;;  %v1318_v47 = vmul.f32 %v1302_v57, %v5559_v32  ;;  %v1365_v61 = vsub.f32 %v1269_v10, %v1349_v11 }
 0x148   :  { %v5584_v24 = vpop.eup %4737  ;;  %4757 = vlog2.f32 %v5516_v56  ;;  %v3613_v50 = vadd.f32 %v4734_v46, %v3565_v14 }
 0x149   :  { %5848 = vst [vmem:[#allocation9_spill] sm:$0xff] %v5579_v1  ;;  %v4740_v33 = vpop.eup %4739  ;;  %v5594_v19 = vmul.f32 %v5584_v24, %v5584_v24  ;;  %4759 = vrcp.f32 %v5469_v6  ;;  %v1334_v48 = vsub.f32 0.083333336, %v1318_v47  ;;  %v3770_v11 = vmul.f32 -0.5, %v5584_v24 }
 0x14a   :  { %v4742_v18 = vpop.eup %4741  ;;  %v5598_v62 = vmul.f32 0.6931472, %v4740_v33  ;;  %4761 = vrcp.f32 %v5488_v8  ;;  %v3661_v47 = vadd.f32 %v4736_v49, %v3613_v50 }
 0x14b   :  { %v4744_v53 = vpop.eup %4743  ;;  %v3706_v42 = vadd.f32 %v4742_v18, %v3658_v51  ;;  %v3786_v40 = vmul.f32 0.003968254, %v5594_v19  ;;  %4763 = vrcp.f32 %v5574_v4  ;;  %v2042_v63 = vmul.f32 0.0005952381, %v5594_v19 }
 0x14c   :  { %v4746_v57 = vpop.eup %4745  ;;  %4765 = vlog2.f32 %v5574_v4  ;;  %v2202_v7 = vmul.f32 %v5545_v15, %v5598_v62  ;;  %v5613_v51 = vadd.f32 %v5540_v55, %v1126_v31  ;;  %v5621_v10 = vmul.f32 %v1334_v48, %v5559_v32 }
 0x14d   :  { %v5609_v17 = vpop.eup %4747  ;;  %v3802_v46 = vsub.f32 0.008333334, %v3786_v40  ;;  %v1384_v14 = vmul.f32 0.6931472, %v4746_v57  ;;  %4767 = vrcp.f32 %v5530_v54  ;;  %v3754_v33 = vadd.f32 %v4744_v53, %v3706_v42 }
 0x14e   :  { %v4750_v27 = vpop.eup %4749  ;;  %v5618_v37 = vmul.f32 %v5609_v17, %v5609_v17  ;;  %4769 = vlog2.f32 %v5464_v60  ;;  %v2058_v1 = vsub.f32 0.0007936508, %v2042_v63  ;;  %v2218_v32 = vsub.f32 %v2202_v7, %v5512_v23 }
 0x14f   :  { %v4752_v15 = vpop.eup %4751  ;;  %v3818_v18 = vmul.f32 %v3802_v46, %v5594_v19  ;;  %v1413_v40 = vadd.f32 %v1384_v14, %v1365_v61  ;;  %4771 = vlog2.f32 %v5365_v28  ;;  %v3772_v53 = vmul.f32 -0.5, %v5609_v17 }
 0x150   :  { %v4754_v55 = vpop.eup %4753  ;;  %v3708_v31 = vadd.f32 %v4752_v15, %v3660_v21  ;;  %v3788_v57 = vmul.f32 0.003968254, %v5618_v37  ;;  %4773 = vlog2.f32 %v5461_v9  ;;  %v5641_v9 = vmul.f32 0.6931472, %v4750_v27 }
 0x151   :  { %v5627_v56 = vpop.eup %4755  ;;  %v3834_v49 = vsub.f32 0.083333336, %v3818_v18  ;;  %v1429_v50 = vsub.f32 %v1413_v40, %v1189_v44  ;;  %4775 = vrcp.f32 %v5556_v35  ;;  %v5849_v44 = vsub.f32 %v5466_v34, %v5453_v26  ;;  %v5850_v40 = vld [vmem:[#allocation12_spill] sm:$0xff] }
 0x152   :  { %v4758_v48 = vpop.eup %4757  ;;  %v3804_v42 = vsub.f32 0.008333334, %v3788_v57  ;;  %v5634_v60 = vmul.f32 %v5627_v56, %v5627_v56  ;;  %v1366_v23 = vsub.f32 %v5604_v39, %v5621_v10  ;;  %4777 = vlog2.f32 %v5481_v29 }
 0x153   :  { %v4760_v28 = vpop.eup %4759  ;;  %v3850_v21 = vmul.f32 %v3834_v49, %v5594_v19  ;;  %v1468_v61 = vsub.f32 %v1429_v50, %v5849_v44  ;;  %v3756_v34 = vadd.f32 %v4754_v55, %v3708_v31  ;;  %v2074_v27 = vmul.f32 %v2058_v1, %v5594_v19 }
 0x154   :  { %v4762_v63 = vpop.eup %4761  ;;  %v3820_v7 = vmul.f32 %v3804_v42, %v5618_v37  ;;  %v3707_v46 = vadd.f32 %v4760_v28, %v5563_v52  ;;  %v3787_v14 = vmul.f32 0.003968254, %v5634_v60  ;;  %v3771_v39 = vmul.f32 -0.5, %v5627_v56 }
 0x155   :  { %v5649_v15 = vpop.eup %4763  ;;  %v3866_v18 = vsub.f32 %v3770_v11, %v3850_v21  ;;  %v1484_v26 = vmul.f32 %v1468_v61, %v5850_v40  ;;  %v5660_v11 = vmul.f32 0.6931472, %v4758_v48  ;;  %v2234_v28 = vadd.f32 0.9189385, %v2218_v32 }
 0x156   :  { %v4766_v57 = vpop.eup %4765  ;;  %v3836_v49 = vsub.f32 0.083333336, %v3820_v7  ;;  %v3803_v10 = vsub.f32 0.008333334, %v3787_v14  ;;  %v5656_v52 = vmul.f32 %v5649_v15, %v5649_v15  ;;  %v3755_v55 = vadd.f32 %v4762_v63, %v3707_v46 }
 0x157   :  { %v4768_v50 = vpop.eup %4767  ;;  %v3882_v29 = vadd.f32 %v3866_v18, %v5598_v62  ;;  %v1504_v42 = vsel %vm178_vm0, %v1484_v26, 0.0  ;;  %v5665_v7 = vmul.f32 0.6931472, %v4766_v57  ;;  %v2090_v14 = vadd.f32 -0.0027777778, %v2074_v27 }
 0x158   :  { %1505 = vadd.xlane.f32.xlu0 %v1504_v42  ;;  %v3852_v1 = vmul.f32 %v3836_v49, %v5618_v37  ;;  %v3819_v31 = vmul.f32 %v3803_v10, %v5634_v60  ;;  %v3789_v21 = vmul.f32 0.003968254, %v5656_v52  ;;  %v4770_v44 = vpop.eup %4769  ;;  %4779 = vlog2.f32 %v5428_v13 }
 0x159   :  { %v3898_v61 = vsub.f32 %v3882_v29, %v3754_v33  ;;  %v4772_v62 = vpop.eup %4771  ;;  %v3709_v40 = vadd.f32 %v4768_v50, %v3661_v47  ;;  %v5851_v63 = vsub.f32 %v5261_v22, %v5174_v12  ;;  %v1386_v49 = vmul.f32 0.6931472, %v4770_v44 }
 0x15a   :  { %v3868_v18 = vsub.f32 %v3772_v53, %v3852_v1  ;;  %v3835_v48 = vsub.f32 0.083333336, %v3819_v31  ;;  %v3805_v32 = vsub.f32 0.008333334, %v3789_v21  ;;  %v4774_v26 = vpop.eup %4773  ;;  %v1803_v10 = vmul.f32 0.6931472, %v4772_v62 }
 0x15b   :  { %v3914_v46 = vsub.f32 %v5851_v63, %v3898_v61  ;;  %v2106_v42 = vmul.f32 %v2090_v14, %v5594_v19  ;;  %v4776_v33 = vpop.eup %4775  ;;  %v1867_v53 = vmul.f32 0.6931472, %v4774_v26  ;;  %v1414_v50 = vadd.f32 %v1386_v49, %v1366_v23 }
 0x15c   :  { %v3884_v57 = vadd.f32 %v3868_v18, %v5641_v9  ;;  %v3851_v27 = vmul.f32 %v3835_v48, %v5634_v60  ;;  %v3821_v13 = vmul.f32 %v3805_v32, %v5656_v52  ;;  %v1834_v29 = vadd.f32 %v1803_v10, %v5407_v0  ;;  %v4778_v12 = vpop.eup %4777 }
 0x15d   :  { %v3930_v47 = vmul.f32 %v5445_v45, %v3914_v46  ;;  %v2122_v1 = vadd.f32 0.083333336, %v2106_v42  ;;  %v3773_v21 = vmul.f32 -0.5, %v5649_v15  ;;  %v1430_v61 = vsub.f32 %v1414_v50, %v5613_v51 }
 0x15e   :  { %v3900_v22 = vsub.f32 %v3884_v57, %v3756_v34  ;;  %v3867_v31 = vsub.f32 %v3771_v39, %v3851_v27  ;;  %v3837_v19 = vsub.f32 0.083333336, %v3821_v13  ;;  %v1898_v14 = vadd.f32 %v1867_v53, %v1834_v29  ;;  %v5857_v27 = vld [vmem:[#allocation19_spill] sm:$0xff]  ;;  %v5860_v29 = vld [vmem:[#allocation18_spill] sm:$0xff] }
 0x15f   :  { %v3946_v44 = vsel %vm178_vm0, %v3930_v47, 0.0  ;;  %v1931_v62 = vmul.f32 0.6931472, %v4778_v12  ;;  %v5852_v45 = vsub.f32 %v5300_v30, %v5264_v36  ;;  %v2138_v34 = vmul.f32 %v5584_v24, %v2122_v1  ;;  %v5859_v53 = vld [vmem:[#allocation7_spill] sm:$0xff]  ;;  %v5861_v1 = vld [vmem:[#allocation20_spill] sm:$0xff] }
 0x160   :  { %3947 = vadd.xlane.f32.xlu1 %v3946_v44  ;;  %v3883_v0 = vadd.f32 %v3867_v31, %v5660_v11  ;;  %v3853_v18 = vmul.f32 %v3837_v19, %v5656_v52  ;;  %v3757_v39 = vadd.f32 %v4776_v33, %v3709_v40  ;;  %4781 = vlog2.f32 %v5477_v2 }
 0x161   :  { %v3916_v23 = vsub.f32 %v5852_v45, %v3900_v22  ;;  %v5686_v48 = vadd.f32 %v1931_v62, %v1898_v14  ;;  %v2044_v51 = vmul.f32 0.0005952381, %v5618_v37  ;;  %v5691_v46 = vadd.f32 %v2234_v28, %v2138_v34  ;;  %v4797_v22 = vld [vmem:[%s5784_s0 + $0x10] sm:$0xff]  ;;  %v5864_v14 = vld [vmem:[#allocation17_spill] sm:$0xff] }
 0x162   :  { %v3899_v26 = vsub.f32 %v3883_v0, %v3755_v55  ;;  %v3869_v63 = vsub.f32 %v3773_v21, %v3853_v18  ;;  %v4780_v36 = vpop.eup %4779  ;;  %v5853_v30 = vsub.f32 %v5505_v43, %v5497_v3  ;;  %4783 = vlog2.f32 %v5494_v58  ;;  %v5855_v3 = vld [vmem:[#allocation14_spill] sm:$0xff]  ;;  %v4798_v21 = vld [vmem:[%s5784_s0 + $0x18] sm:$0xff] }
 0x163   :  { %v3932_v32 = vmul.f32 %v5456_v41, %v3916_v23  ;;  %v2060_v24 = vsub.f32 0.0007936508, %v2044_v51  ;;  %v2204_v40 = vmul.f32 %v5553_v20, %v5641_v9  ;;  %v5854_v41 = vsub.f32 %v5324_v59, %v5295_v25  ;;  %v5856_v9 = vld [vmem:[#allocation10_spill] sm:$0xff]  ;;  %v5858_v59 = vld [vmem:[#allocation15_spill] sm:$0xff] }
 0x164   :  { %v1469_v49 = vsub.f32 %v1430_v61, %v5853_v30  ;;  %v3885_v28 = vadd.f32 %v3869_v63, %v5665_v7  ;;  %v2266_v10 = vsub.f32 %v5691_v46, %v5686_v48  ;;  %v4029_v43 = vmul.f32 %v5855_v3, %v5590_v16  ;;  %v5863_v61 = vld [vmem:[#allocation13_spill] sm:$0xff]  ;;  %v5865_v63 = vld [vmem:[#allocation16_spill] sm:$0xff] }
 0x165   :  { %v3952_v2 = vsel %vm178_vm0, %v3932_v32, 0.0  ;;  %v3915_v55 = vsub.f32 %v5854_v41, %v3899_v26  ;;  %v1807_v58 = vmul.f32 0.6931472, %v4780_v36  ;;  %v2076_v42 = vmul.f32 %v2060_v24, %v5618_v37 }
 0x166   :  { %3953 = vadd.xlane.f32.xlu1 %v3952_v2  ;;  %v2220_v20 = vsub.f32 %v2204_v40, %v5523_v5  ;;  %v3901_v57 = vsub.f32 %v3885_v28, %v3757_v39  ;;  %4785 = vlog2.f32 %v5857_v27  ;;  %v4373_v25 = vadd.f32 -0.5, %v5574_v4  ;;  %v5867_v27 = vld [vmem:[#allocation8_spill] sm:$0xff] }
 0x167   :  { %v3931_v33 = vmul.f32 %v5856_v9, %v3915_v55  ;;  %v1485_v13 = vmul.f32 %v1469_v49, %v5858_v59  ;;  %v1836_v47 = vadd.f32 %v1807_v58, %v5859_v53  ;;  %v2092_v50 = vadd.f32 -0.0027777778, %v2076_v42 }
 0x168   :  { %4787 = vlog2.f32 %v5469_v6  ;;  %v5862_v12 = vsub.f32 %v5860_v29, %v5861_v1  ;;  %v4044_v31 = vmul.f32 %v4797_v22, %v5577_v38  ;;  %v4045_v6 = vmul.f32 %v4798_v21, %v4029_v43 }
 0x169   :  { %v3949_v16 = vsel %vm178_vm0, %v3931_v33, 0.0  ;;  %4789 = vlog2.f32 %v5488_v8  ;;  %v2108_v19 = vmul.f32 %v2092_v50, %v5618_v37  ;;  %v2043_v44 = vmul.f32 0.0005952381, %v5634_v60 }
 0x16a   :  { %v3917_v5 = vsub.f32 %v5862_v12, %v3901_v57  ;;  %3950 = vadd.xlane.f32.xlu0 %v3949_v16  ;;  %4791 = vlog2.f32 %v5863_v61  ;;  %v2045_v38 = vmul.f32 0.0005952381, %v5656_v52  ;;  %v2205_v8 = vmul.f32 %v4373_v25, %v5665_v7  ;;  %v4782_v45 = vpop.eup %4781 }
 0x16b   :  { %4793 = vlog2.f32 %v5530_v54  ;;  %v1507_v23 = vsel %vm178_vm0, %v1485_v13, 0.0  ;;  %v2124_v0 = vadd.f32 0.083333336, %v2108_v19  ;;  %v2059_v18 = vsub.f32 0.0007936508, %v2043_v44 }
 0x16c   :  { %v3933_v62 = vmul.f32 %v5864_v14, %v3917_v5  ;;  %4795 = vlog2.f32 %v5556_v35  ;;  %v1871_v34 = vmul.f32 0.6931472, %v4782_v45  ;;  %v2061_v39 = vsub.f32 0.0007936508, %v2045_v38  ;;  %v4784_v32 = vpop.eup %4783  ;;  %v5868_v5 = vld [vmem:[#allocation9_spill] sm:$0xff]  ;;  %v4063_v45 = vpop.xlane.xlu0 %4062 }
 0x16d   :  { %v2221_v51 = vsub.f32 %v2205_v8, %v5574_v4  ;;  %v2140_v54 = vmul.f32 %v5609_v17, %v2124_v0  ;;  %v2236_v26 = vadd.f32 0.9189385, %v2220_v20  ;;  %v2075_v7 = vmul.f32 %v2059_v18, %v5634_v60  ;;  %v4060_v8 = vpop.xlane.xlu1 %4059 }
 0x16e   :  { %v3955_v37 = vsel %vm178_vm0, %v3933_v62, 0.0  ;;  %1508 = vadd.xlane.f32.xlu0 %v1507_v23  ;;  %v2203_v36 = vmul.f32 %v5865_v63, %v5660_v11  ;;  %v1900_v30 = vadd.f32 %v1871_v34, %v1836_v47  ;;  %v1935_v49 = vmul.f32 0.6931472, %v4784_v32  ;;  %v5866_v11 = vld [vmem:[#allocation11_spill] sm:$0xff] }
 0x16f   :  { %3956 = vadd.xlane.f32.xlu1 %v3955_v37  ;;  %v2077_v35 = vmul.f32 %v2061_v39, %v5656_v52  ;;  %v2252_v24 = vadd.f32 %v2236_v26, %v2140_v54  ;;  %v2091_v40 = vadd.f32 -0.0027777778, %v2075_v7  ;;  %v4064_v4 = vsel %vm178_vm0, %v4044_v31, 0.0 }
 0x170   :  { %v4786_v2 = vpop.eup %4785  ;;  %v4067_v41 = vsel %vm178_vm0, %v4045_v6, 0.0  ;;  %v1964_v55 = vadd.f32 %v1935_v49, %v1900_v30  ;;  %v2219_v58 = vsub.f32 %v2203_v36, %v5866_v11  ;;  %v2959_v0 = vpop.xlane.xlu0 %2958  ;;  %v4287_v11 = vsel %vm4173_vm5, %v4063_v45, 0.0 }
 0x171   :  { %v2093_v28 = vadd.f32 -0.0027777778, %v2077_v35  ;;  %v1805_v3 = vmul.f32 0.6931472, %v4786_v2  ;;  %v2107_v43 = vmul.f32 %v2091_v40, %v5634_v60  ;;  %v2956_v23 = vpop.xlane.xlu1 %2955 }
 0x172   :  { %v4788_v17 = vpop.eup %4787  ;;  %4068 = vadd.xlane.f32.xlu0 %v4067_v41  ;;  %v2268_v20 = vsub.f32 %v2252_v24, %v1964_v55  ;;  %v2235_v60 = vadd.f32 0.9189385, %v2219_v58 }
 0x173   :  { %4065 = vadd.xlane.f32.xlu1 %v4064_v4  ;;  %v4790_v42 = vpop.eup %4789  ;;  %v1869_v9 = vmul.f32 0.6931472, %v4788_v17  ;;  %v2109_v33 = vmul.f32 %v2093_v28, %v5656_v52  ;;  %v1835_v25 = vadd.f32 %v1805_v3, %v5867_v27  ;;  %v2123_v13 = vadd.f32 0.083333336, %v2107_v43 }
 0x174   :  { %v4792_v57 = vpop.eup %4791  ;;  %v1933_v59 = vmul.f32 0.6931472, %v4790_v42  ;;  %v2237_v52 = vadd.f32 0.9189385, %v2221_v51  ;;  %v2965_v18 = vpop.xlane.xlu0 %2964 }
 0x175   :  { %v4794_v53 = vpop.eup %4793  ;;  %v1809_v47 = vmul.f32 0.6931472, %v4792_v57  ;;  %v2125_v50 = vadd.f32 0.083333336, %v2109_v33  ;;  %v1899_v29 = vadd.f32 %v1869_v9, %v1835_v25  ;;  %v2139_v1 = vmul.f32 %v5627_v56, %v2123_v13  ;;  %v2962_v56 = vpop.xlane.xlu1 %2961 }
 0x176   :  { %v4796_v16 = vpop.eup %4795  ;;  %v1873_v12 = vmul.f32 0.6931472, %v4794_v53  ;;  %v3004_v39 = vsub.f32 %v2268_v20, %v2962_v56  ;;  %v4286_v57 = vsel %vm4173_vm5, %v4060_v8, 0.0 }
 0x177   :  { %v1837_v22 = vadd.f32 %v1809_v47, %v5868_v5  ;;  %v1937_v31 = vmul.f32 0.6931472, %v4796_v16  ;;  %v2141_v21 = vmul.f32 %v5649_v15, %v2125_v50  ;;  %v1963_v6 = vadd.f32 %v1933_v59, %v1899_v29 }
 0x178   :  { %v2251_v19 = vadd.f32 %v2235_v60, %v2139_v1  ;;  %v1503_v34 = vpop.xlane.xlu0 %1502  ;;  %v3002_v15 = vsub.f32 %v2266_v10, %v2956_v23  ;;  %v4404_v7 = vadd.f32 -1.7917595, %v3004_v39  ;;  %v4288_v25 = vadd.f32 %v4287_v11, %v4286_v57 }
 0x179   :  { %v1901_v44 = vadd.f32 %v1873_v12, %v1837_v22  ;;  %v2253_v61 = vadd.f32 %v2237_v52, %v2141_v21  ;;  %v1500_v37 = vpop.xlane.xlu1 %1499  ;;  %v4175_v49 = vsel %vm4173_vm5, %v1503_v34, 0.0  ;;  %v5870_v34 = vld [vmem:[#allocation6_spill] sm:$0xff] }
 0x17a   :  { %v2267_v14 = vsub.f32 %v2251_v19, %v1963_v6  ;;  %v4402_v26 = vadd.f32 -1.7917595, %v3002_v15  ;;  %v4174_v40 = vsel %vm4173_vm5, %v1500_v37, 0.0  ;;  %v5869_v37 = vld [vmem:[#allocation5_spill] sm:$0xff]  ;;  %vm4327_vm7 = vcmp.eq.s32.totalorder %v5870_v34, 0 }
 0x17b   :  { %v1965_v62 = vadd.f32 %v1937_v31, %v1901_v44  ;;  %v4176_v10 = vadd.f32 %v4175_v49, %v4174_v40  ;;  %vm4326_vm6 = vcmp.eq.s32.totalorder %v5869_v37, 0  ;;  %vm4331_vm9 = vcmp.eq.s32.totalorder %v5870_v34, 1 }
 0x17c   :  { %v3003_v54 = vsub.f32 %v2267_v14, %v2959_v0  ;;  %vm4328_vm8 = vmand %vm4326_vm6, %vm4327_vm7  ;;  %vm4335_vm10 = vcmp.eq.s32.totalorder %v5870_v34, 2 }
 0x17d   :  { %v2269_v38 = vsub.f32 %v2253_v61, %v1965_v62  ;;  %vm4332_vm11 = vmand %vm4326_vm6, %vm4331_vm9 }
 0x17e   :  { %v4403_v36 = vadd.f32 -1.7917595, %v3003_v54  ;;  %vm4336_vm12 = vmand %vm4326_vm6, %vm4335_vm10 }
 0x17f   :  { %v3005_v30 = vsub.f32 %v2269_v38, %v2965_v18 }
 0x181   :  { %v4405_v4 = vadd.f32 -1.7917595, %v3005_v30 }
 0x1e5   :  { %v1506_v32 = vpop.xlane.xlu0 %1505 }
 0x1e6   :  { %v4177_v2 = vsel %vm4173_vm5, %v1506_v32, 0.0 }
 0x1e7   :  { %v4178_v28 = vadd.f32 %v4177_v2, %v4176_v10 }
 0x1ed   :  { %v3948_v51 = vpop.xlane.xlu1 %3947 }
 0x1ee   :  { %v3994_v35 = vadd.f32 %v4402_v26, %v3948_v51 }
 0x1f0   :  { %v4230_v41 = vsel %vm4173_vm5, %v3994_v35, 0.0 }
 0x1f3   :  { %v3954_v63 = vpop.xlane.xlu1 %3953 }
 0x1f4   :  { %v3996_v48 = vadd.f32 %v4404_v7, %v3954_v63 }
 0x1f6   :  { %v4233_v58 = vsel %vm4173_vm5, %v3996_v48, 0.0 }
 0x1f7   :  { %v3951_v24 = vpop.xlane.xlu0 %3950 }
 0x1f8   :  { %v3995_v46 = vadd.f32 %v4403_v36, %v3951_v24 }
 0x1fa   :  { %v4231_v55 = vsel %vm4173_vm5, %v3995_v46, 0.0 }
 0x1fb   :  { %v4232_v17 = vadd.f32 %v4231_v55, %v4230_v41  ;;  %v1509_v43 = vpop.xlane.xlu0 %1508 }
 0x1fc   :  { %v3957_v3 = vpop.xlane.xlu1 %3956  ;;  %v4179_v20 = vsel %vm4173_vm5, %v1509_v43, 0.0 }
 0x1fd   :  { %v3997_v42 = vadd.f32 %v4405_v4, %v3957_v3  ;;  %v4180_v9 = vadd.f32 %v4179_v20, %v4178_v28  ;;  %v4234_v33 = vadd.f32 %v4233_v58, %v4232_v17 }
 0x1ff   :  { %v4235_v27 = vsel %vm4173_vm5, %v3997_v42, 0.0  ;;  %4205 = vadd.xlane.f32.xlu1 %v4180_v9  ;;  %v4069_v13 = vpop.xlane.xlu0 %4068 }
 0x200   :  { %v4066_v59 = vpop.xlane.xlu1 %4065  ;;  %v4236_v53 = vadd.f32 %v4235_v27, %v4234_v33  ;;  %v4291_v16 = vsel %vm4173_vm5, %v4069_v13, 0.0 }
 0x201   :  { %v4289_v47 = vsel %vm4173_vm5, %v4066_v59, 0.0 }
 0x202   :  { %v4290_v50 = vadd.f32 %v4289_v47, %v4288_v25  ;;  %4261 = vadd.xlane.f32.xlu0 %v4236_v53 }
 0x204   :  { %v4292_v29 = vadd.f32 %v4291_v16, %v4290_v50 }
 0x206   :  { %4317 = vadd.xlane.f32.xlu1 %v4292_v29 }
 0x28c   :  { %v4206_v1 = vpop.xlane.xlu1 %4205 }
 0x28d   :  { %v4207_v60 = vrot.slane %v4206_v1, 4 }
 0x28f   :  { %v4262_v12 = vpop.xlane.xlu0 %4261  ;;  %v4208_v5 = vadd.f32 %v4207_v60, %v4206_v1 }
 0x290   :  { %v4263_v22 = vrot.slane %v4262_v12, 4 }
 0x291   :  { %v4209_v31 = vrot.slane %v4208_v5, 2 }
 0x292   :  { %v4264_v21 = vadd.f32 %v4263_v22, %v4262_v12 }
 0x293   :  { %v4318_v52 = vpop.xlane.xlu1 %4317  ;;  %v4210_v44 = vadd.f32 %v4209_v31, %v4208_v5 }
 0x294   :  { %v4265_v6 = vrot.slane %v4264_v21, 2  ;;  %v4319_v19 = vrot.slane %v4318_v52, 4 }
 0x295   :  { %v4211_v62 = vrot.slane %v4210_v44, 1 }
 0x296   :  { %v4266_v61 = vadd.f32 %v4265_v6, %v4264_v21  ;;  %v4320_v14 = vadd.f32 %v4319_v19, %v4318_v52 }
 0x297   :  { %v4212_v8 = vadd.f32 %v4211_v62, %v4210_v44 }
 0x298   :  { %v4321_v38 = vrot.slane %v4320_v14, 2  ;;  %v4267_v45 = vrot.slane %v4266_v61, 1 }
 0x299   :  { %4434 = vpush %v4212_v8 }
 0x29a   :  { %v4322_v23 = vadd.f32 %v4321_v38, %v4320_v14  ;;  %v4268_v0 = vadd.f32 %v4267_v45, %v4266_v61 }
 0x29c   :  { %4436 = vpush %v4268_v0  ;;  %v4323_v56 = vrot.slane %v4322_v23, 1 }
 0x29e   :  { %v4324_v18 = vadd.f32 %v4323_v56, %v4322_v23 }
 0x2a0   :  { %4438 = vpush %v4324_v18 }
 0x2ca   :  { %s4435_s0 = spop %4434 }
 0x2cb   :  { %v4329_v15 = vstv %s4435_s0 }
 0x2cc   :  { %v4330_v39 = vsel %vm4328_vm8, %v4329_v15, 0.0 }
 0x2cd   :  { %s4437_s5 = spop %4436 }
 0x2ce   :  { %v4333_v51 = vstv %s4437_s5 }
 0x2cf   :  { %v4334_v32 = vsel %vm4332_vm11, %v4333_v51, %v4330_v39 }
 0x2d1   :  { %s4439_s8 = spop %4438 }
 0x2d2   :  { %v4337_v54 = vstv %s4439_s8 }
 0x2d3   :  { %v4338_v26 = vsel %vm4336_vm12, %v4337_v54, %v4334_v32 }
 0x2d4   :  { %4339 = vst [vmem:[#allocation2] sm:$0xff] %v4338_v26 }
 0x2d5   :  { %4810 = shalt.err (!%p4807_p4)
}
 0x2d6   :  { %s4811_s12 = scalar_lea.hbm %s5787_s3, 128 }
 0x2d7   :  { %p4812_p5 = scmp.ne.s32.totalorder %s5787_s3, %s4811_s12  ;;  %p4815_p6 = scmp.lt.u32.totalorder %s4811_s12, %s5787_s3 }
 0x2d9   :  { %p4817_p7 = pnand %p4815_p6, %p4812_p5 }
 0x2db   :  { %4820 = shalt.err (!%p4817_p7)
}
 0x2dc   :  { %4349 = dma.vmem_to_hbm [thread:$0]  %s4347_s7, 128, %s5787_s3, [#allocation3]  }
 0x2dd   :  { %4821 = dma.done.wait [#allocation3], 128  }
 0x2de   :  { %4822 = vsyncadd [#allocation3], 4294967168 }
 0x2df   :  { %4353 = vsyncpa [#allocation3], 1 }

</bundles_post_ra>
